<compile_context>
chip_gen: v5e
topology: v5e:2x2
jax: 0.10.0
libtpu: 0.0.40
codegen_flags: <defaults>
</compile_context>

<pallas_src>
import functools

import jax
import jax.numpy as jnp
from jax.experimental import pallas as pl
from jax.experimental.pallas import tpu as pltpu


def _round_up(v, m):
    return (v + m - 1) // m * m


def _bspline_basis(x, knots, degree):
    """Cox-de Boor recursion, fully unrolled at trace time (knots are Python floats).

    Returns a list of len(knots) - degree - 1 arrays, each the same shape as x,
    holding B_k^degree(x).  Knot-span reciprocals are folded into compile-time
    constants and the x * (1/den) products are cached so uniform knots share
    them across k (fewer VALU multiplies)."""
    n0 = len(knots) - 1
    B = [jnp.where((x >= knots[k]) & (x < knots[k + 1]), 1.0, 0.0) for k in range(n0)]
    for d in range(1, degree + 1):
        xscaled = {}

        def xs(inv):
            if inv not in xscaled:
                xscaled[inv] = x * inv
            return xscaled[inv]

        newB = []
        for k in range(len(B) - 1):
            term = None
            den1 = knots[k + d] - knots[k]
            if den1 > 0.0:
                inv1 = 1.0 / den1
                term = B[k] * (xs(inv1) - knots[k] * inv1)
            den2 = knots[k + d + 1] - knots[k + 1]
            if den2 > 0.0:
                inv2 = 1.0 / den2
                t2 = B[k + 1] * (knots[k + d + 1] * inv2 - xs(inv2))
                term = t2 if term is None else term + t2
            if term is None:
                term = jnp.zeros_like(x)
            newB.append(term)
        B = newB
    return B


def _kan_kernel(x_ref, w_ref, o_ref, act_ref, *, knots, degree, n_coef, in_pad,
                row_chunk, mxu_dtype):
    # Build the fused activation matrix [silu(x) | B_1(x) | ... | B_{n_coef}(x)]
    # only once per batch tile: the out-dim grid axis (axis 1) is innermost and
    # "arbitrary", so the scratch is carried across it.
    @pl.when(pl.program_id(1) == 0)
    def _build_activations():
        bt = x_ref.shape[0]
        # Process rows in sub-chunks to keep the (n_coef + degree) live Cox-de
        # Boor arrays inside the 64-vreg file (no spill traffic).
        for r0 in range(0, bt, row_chunk):
            xs = x_ref[r0:r0 + row_chunk, :]                      # (row_chunk, in_pad) f32
            # SiLU(x) = x * sigmoid(x); denominator reciprocal on the EUP slot.
            sig = pl.reciprocal(1.0 + jnp.exp(-xs), approx=False)
            act_ref[r0:r0 + row_chunk, 0:in_pad] = (xs * sig).astype(mxu_dtype)
            basis = _bspline_basis(xs, knots, degree)             # n_coef x (row_chunk, in_pad)
            for k in range(n_coef):
                act_ref[r0:r0 + row_chunk,
                        (k + 1) * in_pad:(k + 2) * in_pad] = basis[k].astype(mxu_dtype)

    # Single fused MXU matmul, f32 accumulation.
    o_ref[...] = jnp.dot(act_ref[...], w_ref[...],
                         preferred_element_type=jnp.float32).astype(o_ref.dtype)


def pack_kan_weights(w_basis, w_spline, coef, in_pad, out_pad, dtype):
    """Pack (w_basis, w_spline, coef) into one ((n_coef+1)*in_pad, out_pad) matrix.

    NOTE: if the parameters are static across steps, hoist/precompute this once
    outside the forward pass instead of re-materializing it every call."""
    in_dim, out_dim, n_coef = coef.shape
    w = jnp.zeros((n_coef + 1, in_pad, out_pad), dtype=jnp.float32)
    w = w.at[0, :in_dim, :out_dim].set(w_basis.astype(jnp.float32))
    spl = (w_spline[:, :, None] * coef).astype(jnp.float32)       # (in_dim, out_dim, n_coef)
    w = w.at[1:, :in_dim, :out_dim].set(jnp.moveaxis(spl, -1, 0))
    return w.reshape((n_coef + 1) * in_pad, out_pad).astype(dtype)


def kan_layer_forward(x, w_basis, w_spline, coef, knots, degree, *,
                      batch_tile=128, out_tile=128, mxu_dtype=jnp.float32):
    """x: (batch, in_dim); w_basis, w_spline: (in_dim, out_dim); coef: (in_dim, out_dim, n_coef)."""
    batch, in_dim = x.shape
    in_dim2, out_dim, n_coef = coef.shape
    assert in_dim == in_dim2
    knots = tuple(float(t) for t in knots)
    degree = int(degree)
    assert len(knots) == n_coef + degree + 1

    # Padded, lane/sublane-dense shapes.
    in_pad = _round_up(in_dim, 128)
    bt = min(batch_tile, _round_up(batch, 8))
    bt = _round_up(bt, 8)
    batch_pad = _round_up(batch, bt)
    ot = min(out_tile, _round_up(out_dim, 128))
    ot = _round_up(ot, 128)
    out_pad = _round_up(out_dim, ot)
    K = (n_coef + 1) * in_pad
    row_chunk = 32 if bt % 32 == 0 else bt

    x_p = jnp.zeros((batch_pad, in_pad), jnp.float32).at[:batch, :in_dim].set(
        x.astype(jnp.float32))
    w_p = pack_kan_weights(w_basis, w_spline, coef, in_pad, out_pad, mxu_dtype)

    kernel = functools.partial(
        _kan_kernel, knots=knots, degree=degree, n_coef=n_coef, in_pad=in_pad,
        row_chunk=row_chunk, mxu_dtype=mxu_dtype)

    itemsize = jnp.dtype(mxu_dtype).itemsize
    cost = pl.CostEstimate(
        flops=2 * batch_pad * K * out_pad + 200 * batch_pad * in_pad,
        transcendentals=batch_pad * in_pad,
        bytes_accessed=(x_p.size * 4 + w_p.size * itemsize + batch_pad * out_pad * 4),
    )

    grid = (batch_pad // bt, out_pad // ot)
    out = pl.pallas_call(
        kernel,
        out_shape=jax.ShapeDtypeStruct((batch_pad, out_pad), jnp.float32),
        grid_spec=pltpu.PrefetchScalarGridSpec(
            num_scalar_prefetch=0,
            grid=grid,
            in_specs=[
                pl.BlockSpec((bt, in_pad), lambda b, o: (b, 0)),   # x: constant in out axis
                pl.BlockSpec((K, ot), lambda b, o: (0, o)),        # W: constant in batch axis
            ],
            out_specs=pl.BlockSpec((bt, ot), lambda b, o: (b, o)),
            scratch_shapes=[pltpu.VMEM((bt, K), mxu_dtype)],       # fused activation matrix
        ),
        compiler_params=pltpu.CompilerParams(
            # batch axis parallel (shards across 2 TCs on v7x); out axis must be
            # sequential because the activation scratch is carried across it.
            dimension_semantics=("parallel", "arbitrary"),
            vmem_limit_bytes=32 * 1024 * 1024,
        ),
        cost_estimate=cost,
    )(x_p, w_p)
    return out[:batch, :out_dim]


def kan_layer_ref(x, w_basis, w_spline, coef, knots, degree):
    """Pure-JAX reference mirroring the PyTorch loop-nest semantics."""
    knots = tuple(float(t) for t in knots)
    basis = _bspline_basis(x, knots, degree)                 # n_coef x (batch, in_dim)
    bstack = jnp.stack(basis, axis=-1)                       # (batch, in_dim, n_coef)
    spline = jnp.einsum("bik,ijk->bij", bstack, coef)        # BSpline_{i,j}(x[b,i])
    silu = x * jax.nn.sigmoid(x)
    return jnp.einsum("bi,ij->bj", silu, w_basis) + jnp.einsum("bij,ij->bj", spline, w_spline)


if __name__ == "__main__":
    in_dim, out_dim = 16, 32
    degree, n_coef = 3, 10
    batch = 8

    # knots = torch.linspace(0, 1, coefficients + degree + 1)
    knots = [i / (n_coef + degree) for i in range(n_coef + degree + 1)]

    key = jax.random.PRNGKey(0)
    k1, k2, k3 = jax.random.split(key, 3)

    # Parameter shapes match KANLayer.__init__ (one ResidualActivationFunction per (i, j)):
    #   coefficients: (in_dim, out_dim, n_coef) (zeros in torch; random here so the
    #                                            spline path is actually exercised)
    #   w_basis:      (in_dim, out_dim)          uniform(-1, 1) as in torch init
    #   w_spline:     (in_dim, out_dim)          ones as in torch init
    coef = 0.1 * jax.random.normal(k1, (in_dim, out_dim, n_coef), dtype=jnp.float32)
    w_basis = jax.random.uniform(k2, (in_dim, out_dim), minval=-1.0, maxval=1.0,
                                 dtype=jnp.float32)
    w_spline = jnp.ones((in_dim, out_dim), dtype=jnp.float32)

    # Inputs drawn inside the knot domain [0, 1) where Cox-de Boor == scipy BSpline.
    # TODO(synk): scipy BSpline extrapolate=True behavior outside [0, 1] (and the
    # right-boundary point x == 1.0) is not replicated by the half-open indicators.
    x = jax.random.uniform(k3, (batch, in_dim), dtype=jnp.float32)

    ref = kan_layer_ref(x, w_basis, w_spline, coef, knots, degree)

    # f32 MXU path.
    out = kan_layer_forward(x, w_basis, w_spline, coef, knots, degree)
    out = jax.block_until_ready(out)
    assert out.shape == (batch, out_dim), out.shape
    max_err = float(jnp.max(jnp.abs(out - ref)))
    assert jnp.allclose(out, ref, atol=5e-4, rtol=5e-4), f"f32 path max err {max_err}"

    # bf16-at-the-MXU path (f32 accumulation) — halves weight footprint, full-rate MXU.
    out_bf16 = kan_layer_forward(x, w_basis, w_spline, coef, knots, degree,
                                 mxu_dtype=jnp.bfloat16)
    out_bf16 = jax.block_until_ready(out_bf16)
    max_err_bf16 = float(jnp.max(jnp.abs(out_bf16 - ref)))
    assert jnp.allclose(out_bf16, ref, atol=1e-1, rtol=5e-2), f"bf16 path max err {max_err_bf16}"

    print("KERNEL_OK")
</pallas_src>

<mosaic_0001>
module attributes {stable_mosaic.version = 11 : i64} {
  func.func @_kan_kernel(%arg0: i32, %arg1: i32, %arg2: memref<8x128xf32, #tpu.memory_space<vmem>>, %arg3: memref<1408x128xf32, #tpu.memory_space<vmem>>, %arg4: memref<8x128xf32, #tpu.memory_space<vmem>>, %arg5: memref<8x1408xf32, #tpu.memory_space<vmem>>) attributes {dimension_semantics = [#tpu.dimension_semantics<parallel>, #tpu.dimension_semantics<arbitrary>], iteration_bounds = array<i64: 1, 1>, scalar_prefetch = 0 : i64, scratch_operands = 1 : i64, tpu.core_type = #tpu.core_type<tc>, window_params = [{transform_indices = @transform_0, window_bounds = array<i64: 8, 128>}, {transform_indices = @transform_1, window_bounds = array<i64: 1408, 128>}, {transform_indices = @transform_2, window_bounds = array<i64: 8, 128>}]} {
    %c0_i32 = arith.constant 0 : i32
    %0 = arith.cmpi eq, %arg1, %c0_i32 : i32
    %1 = arith.extui %0 : i1 to i32
    %c0_i32_0 = arith.constant 0 : i32
    %2 = arith.cmpi ne, %1, %c0_i32_0 : i32
    scf.if %2 {
      %c0_6 = arith.constant 0 : index
      %c0_7 = arith.constant 0 : index
      %7 = vector.load %arg2[%c0_6, %c0_7] : memref<8x128xf32, #tpu.memory_space<vmem>>, vector<8x128xf32>
      %cst_8 = arith.constant 0.000000e+00 : f32
      %8 = vector.broadcast %cst_8 : f32 to vector<8x128xf32>
      %9 = arith.subf %8, %7 : vector<8x128xf32>
      %10 = math.exp %9 : vector<8x128xf32>
      %cst_9 = arith.constant 1.000000e+00 : f32
      %11 = vector.broadcast %cst_9 : f32 to vector<8x128xf32>
      %12 = arith.addf %11, %10 : vector<8x128xf32>
      %13 = tpu.reciprocal %12 : vector<8x128xf32> -> vector<8x128xf32>
      %14 = arith.mulf %7, %13 : vector<8x128xf32>
      %c0_10 = arith.constant 0 : index
      %c0_11 = arith.constant 0 : index
      %15 = vector.load %arg5[%c0_10, %c0_11] : memref<8x1408xf32, #tpu.memory_space<vmem>>, vector<8x128xf32>
      tpu.vector_store %arg5[%c0_10, %c0_11], %14 {strides = array<i32>} : memref<8x1408xf32, #tpu.memory_space<vmem>>, vector<8x128xf32>,
      %cst_12 = arith.constant 0.000000e+00 : f32
      %16 = vector.broadcast %cst_12 : f32 to vector<8x128xf32>
      %17 = arith.cmpf oge, %7, %16 : vector<8x128xf32>
      %cst_13 = arith.constant 0.0769230798 : f32
      %18 = vector.broadcast %cst_13 : f32 to vector<8x128xf32>
      %19 = arith.cmpf olt, %7, %18 : vector<8x128xf32>
      %20 = arith.andi %17, %19 : vector<8x128xi1>
      %cst_14 = arith.constant 1.000000e+00 : f32
      %cst_15 = arith.constant 0.000000e+00 : f32
      %21 = vector.broadcast %cst_14 : f32 to vector<8x128xf32>
      %22 = vector.broadcast %cst_15 : f32 to vector<8x128xf32>
      %23 = arith.select %20, %21, %22 : vector<8x128xi1>, vector<8x128xf32>
      %cst_16 = arith.constant 0.0769230798 : f32
      %24 = vector.broadcast %cst_16 : f32 to vector<8x128xf32>
      %25 = arith.cmpf oge, %7, %24 : vector<8x128xf32>
      %cst_17 = arith.constant 0.15384616 : f32
      %26 = vector.broadcast %cst_17 : f32 to vector<8x128xf32>
      %27 = arith.cmpf olt, %7, %26 : vector<8x128xf32>
      %28 = arith.andi %25, %27 : vector<8x128xi1>
      %cst_18 = arith.constant 1.000000e+00 : f32
      %cst_19 = arith.constant 0.000000e+00 : f32
      %29 = vector.broadcast %cst_18 : f32 to vector<8x128xf32>
      %30 = vector.broadcast %cst_19 : f32 to vector<8x128xf32>
      %31 = arith.select %28, %29, %30 : vector<8x128xi1>, vector<8x128xf32>
      %cst_20 = arith.constant 0.15384616 : f32
      %32 = vector.broadcast %cst_20 : f32 to vector<8x128xf32>
      %33 = arith.cmpf oge, %7, %32 : vector<8x128xf32>
      %cst_21 = arith.constant 0.230769232 : f32
      %34 = vector.broadcast %cst_21 : f32 to vector<8x128xf32>
      %35 = arith.cmpf olt, %7, %34 : vector<8x128xf32>
      %36 = arith.andi %33, %35 : vector<8x128xi1>
      %cst_22 = arith.constant 1.000000e+00 : f32
      %cst_23 = arith.constant 0.000000e+00 : f32
      %37 = vector.broadcast %cst_22 : f32 to vector<8x128xf32>
      %38 = vector.broadcast %cst_23 : f32 to vector<8x128xf32>
      %39 = arith.select %36, %37, %38 : vector<8x128xi1>, vector<8x128xf32>
      %cst_24 = arith.constant 0.230769232 : f32
      %40 = vector.broadcast %cst_24 : f32 to vector<8x128xf32>
      %41 = arith.cmpf oge, %7, %40 : vector<8x128xf32>
      %cst_25 = arith.constant 0.307692319 : f32
      %42 = vector.broadcast %cst_25 : f32 to vector<8x128xf32>
      %43 = arith.cmpf olt, %7, %42 : vector<8x128xf32>
      %44 = arith.andi %41, %43 : vector<8x128xi1>
      %cst_26 = arith.constant 1.000000e+00 : f32
      %cst_27 = arith.constant 0.000000e+00 : f32
      %45 = vector.broadcast %cst_26 : f32 to vector<8x128xf32>
      %46 = vector.broadcast %cst_27 : f32 to vector<8x128xf32>
      %47 = arith.select %44, %45, %46 : vector<8x128xi1>, vector<8x128xf32>
      %cst_28 = arith.constant 0.307692319 : f32
      %48 = vector.broadcast %cst_28 : f32 to vector<8x128xf32>
      %49 = arith.cmpf oge, %7, %48 : vector<8x128xf32>
      %cst_29 = arith.constant 0.384615391 : f32
      %50 = vector.broadcast %cst_29 : f32 to vector<8x128xf32>
      %51 = arith.cmpf olt, %7, %50 : vector<8x128xf32>
      %52 = arith.andi %49, %51 : vector<8x128xi1>
      %cst_30 = arith.constant 1.000000e+00 : f32
      %cst_31 = arith.constant 0.000000e+00 : f32
      %53 = vector.broadcast %cst_30 : f32 to vector<8x128xf32>
      %54 = vector.broadcast %cst_31 : f32 to vector<8x128xf32>
      %55 = arith.select %52, %53, %54 : vector<8x128xi1>, vector<8x128xf32>
      %cst_32 = arith.constant 0.384615391 : f32
      %56 = vector.broadcast %cst_32 : f32 to vector<8x128xf32>
      %57 = arith.cmpf oge, %7, %56 : vector<8x128xf32>
      %cst_33 = arith.constant 0.461538464 : f32
      %58 = vector.broadcast %cst_33 : f32 to vector<8x128xf32>
      %59 = arith.cmpf olt, %7, %58 : vector<8x128xf32>
      %60 = arith.andi %57, %59 : vector<8x128xi1>
      %cst_34 = arith.constant 1.000000e+00 : f32
      %cst_35 = arith.constant 0.000000e+00 : f32
      %61 = vector.broadcast %cst_34 : f32 to vector<8x128xf32>
      %62 = vector.broadcast %cst_35 : f32 to vector<8x128xf32>
      %63 = arith.select %60, %61, %62 : vector<8x128xi1>, vector<8x128xf32>
      %cst_36 = arith.constant 0.461538464 : f32
      %64 = vector.broadcast %cst_36 : f32 to vector<8x128xf32>
      %65 = arith.cmpf oge, %7, %64 : vector<8x128xf32>
      %cst_37 = arith.constant 0.538461566 : f32
      %66 = vector.broadcast %cst_37 : f32 to vector<8x128xf32>
      %67 = arith.cmpf olt, %7, %66 : vector<8x128xf32>
      %68 = arith.andi %65, %67 : vector<8x128xi1>
      %cst_38 = arith.constant 1.000000e+00 : f32
      %cst_39 = arith.constant 0.000000e+00 : f32
      %69 = vector.broadcast %cst_38 : f32 to vector<8x128xf32>
      %70 = vector.broadcast %cst_39 : f32 to vector<8x128xf32>
      %71 = arith.select %68, %69, %70 : vector<8x128xi1>, vector<8x128xf32>
      %cst_40 = arith.constant 0.538461566 : f32
      %72 = vector.broadcast %cst_40 : f32 to vector<8x128xf32>
      %73 = arith.cmpf oge, %7, %72 : vector<8x128xf32>
      %cst_41 = arith.constant 0.615384638 : f32
      %74 = vector.broadcast %cst_41 : f32 to vector<8x128xf32>
      %75 = arith.cmpf olt, %7, %74 : vector<8x128xf32>
      %76 = arith.andi %73, %75 : vector<8x128xi1>
      %cst_42 = arith.constant 1.000000e+00 : f32
      %cst_43 = arith.constant 0.000000e+00 : f32
      %77 = vector.broadcast %cst_42 : f32 to vector<8x128xf32>
      %78 = vector.broadcast %cst_43 : f32 to vector<8x128xf32>
      %79 = arith.select %76, %77, %78 : vector<8x128xi1>, vector<8x128xf32>
      %cst_44 = arith.constant 0.615384638 : f32
      %80 = vector.broadcast %cst_44 : f32 to vector<8x128xf32>
      %81 = arith.cmpf oge, %7, %80 : vector<8x128xf32>
      %cst_45 = arith.constant 0.692307711 : f32
      %82 = vector.broadcast %cst_45 : f32 to vector<8x128xf32>
      %83 = arith.cmpf olt, %7, %82 : vector<8x128xf32>
      %84 = arith.andi %81, %83 : vector<8x128xi1>
      %cst_46 = arith.constant 1.000000e+00 : f32
      %cst_47 = arith.constant 0.000000e+00 : f32
      %85 = vector.broadcast %cst_46 : f32 to vector<8x128xf32>
      %86 = vector.broadcast %cst_47 : f32 to vector<8x128xf32>
      %87 = arith.select %84, %85, %86 : vector<8x128xi1>, vector<8x128xf32>
      %cst_48 = arith.constant 0.692307711 : f32
      %88 = vector.broadcast %cst_48 : f32 to vector<8x128xf32>
      %89 = arith.cmpf oge, %7, %88 : vector<8x128xf32>
      %cst_49 = arith.constant 0.769230782 : f32
      %90 = vector.broadcast %cst_49 : f32 to vector<8x128xf32>
      %91 = arith.cmpf olt, %7, %90 : vector<8x128xf32>
      %92 = arith.andi %89, %91 : vector<8x128xi1>
      %cst_50 = arith.constant 1.000000e+00 : f32
      %cst_51 = arith.constant 0.000000e+00 : f32
      %93 = vector.broadcast %cst_50 : f32 to vector<8x128xf32>
      %94 = vector.broadcast %cst_51 : f32 to vector<8x128xf32>
      %95 = arith.select %92, %93, %94 : vector<8x128xi1>, vector<8x128xf32>
      %cst_52 = arith.constant 0.769230782 : f32
      %96 = vector.broadcast %cst_52 : f32 to vector<8x128xf32>
      %97 = arith.cmpf oge, %7, %96 : vector<8x128xf32>
      %cst_53 = arith.constant 0.846153855 : f32
      %98 = vector.broadcast %cst_53 : f32 to vector<8x128xf32>
      %99 = arith.cmpf olt, %7, %98 : vector<8x128xf32>
      %100 = arith.andi %97, %99 : vector<8x128xi1>
      %cst_54 = arith.constant 1.000000e+00 : f32
      %cst_55 = arith.constant 0.000000e+00 : f32
      %101 = vector.broadcast %cst_54 : f32 to vector<8x128xf32>
      %102 = vector.broadcast %cst_55 : f32 to vector<8x128xf32>
      %103 = arith.select %100, %101, %102 : vector<8x128xi1>, vector<8x128xf32>
      %cst_56 = arith.constant 0.846153855 : f32
      %104 = vector.broadcast %cst_56 : f32 to vector<8x128xf32>
      %105 = arith.cmpf oge, %7, %104 : vector<8x128xf32>
      %cst_57 = arith.constant 0.923076927 : f32
      %106 = vector.broadcast %cst_57 : f32 to vector<8x128xf32>
      %107 = arith.cmpf olt, %7, %106 : vector<8x128xf32>
      %108 = arith.andi %105, %107 : vector<8x128xi1>
      %cst_58 = arith.constant 1.000000e+00 : f32
      %cst_59 = arith.constant 0.000000e+00 : f32
      %109 = vector.broadcast %cst_58 : f32 to vector<8x128xf32>
      %110 = vector.broadcast %cst_59 : f32 to vector<8x128xf32>
      %111 = arith.select %108, %109, %110 : vector<8x128xi1>, vector<8x128xf32>
      %cst_60 = arith.constant 0.923076927 : f32
      %112 = vector.broadcast %cst_60 : f32 to vector<8x128xf32>
      %113 = arith.cmpf oge, %7, %112 : vector<8x128xf32>
      %cst_61 = arith.constant 1.000000e+00 : f32
      %114 = vector.broadcast %cst_61 : f32 to vector<8x128xf32>
      %115 = arith.cmpf olt, %7, %114 : vector<8x128xf32>
      %116 = arith.andi %113, %115 : vector<8x128xi1>
      %cst_62 = arith.constant 1.000000e+00 : f32
      %cst_63 = arith.constant 0.000000e+00 : f32
      %117 = vector.broadcast %cst_62 : f32 to vector<8x128xf32>
      %118 = vector.broadcast %cst_63 : f32 to vector<8x128xf32>
      %119 = arith.select %116, %117, %118 : vector<8x128xi1>, vector<8x128xf32>
      %cst_64 = arith.constant 1.300000e+01 : f32
      %120 = vector.broadcast %cst_64 : f32 to vector<8x128xf32>
      %121 = arith.mulf %7, %120 : vector<8x128xf32>
      %cst_65 = arith.constant 0.000000e+00 : f32
      %122 = vector.broadcast %cst_65 : f32 to vector<8x128xf32>
      %123 = arith.subf %121, %122 : vector<8x128xf32>
      %124 = arith.mulf %23, %123 : vector<8x128xf32>
      %cst_66 = arith.constant 2.000000e+00 : f32
      %125 = vector.broadcast %cst_66 : f32 to vector<8x128xf32>
      %126 = arith.subf %125, %121 : vector<8x128xf32>
      %127 = arith.mulf %31, %126 : vector<8x128xf32>
      %128 = arith.addf %124, %127 : vector<8x128xf32>
      %cst_67 = arith.constant 1.000000e+00 : f32
      %129 = vector.broadcast %cst_67 : f32 to vector<8x128xf32>
      %130 = arith.subf %121, %129 : vector<8x128xf32>
      %131 = arith.mulf %31, %130 : vector<8x128xf32>
      %cst_68 = arith.constant 3.000000e+00 : f32
      %132 = vector.broadcast %cst_68 : f32 to vector<8x128xf32>
      %133 = arith.subf %132, %121 : vector<8x128xf32>
      %134 = arith.mulf %39, %133 : vector<8x128xf32>
      %135 = arith.addf %131, %134 : vector<8x128xf32>
      %cst_69 = arith.constant 2.000000e+00 : f32
      %136 = vector.broadcast %cst_69 : f32 to vector<8x128xf32>
      %137 = arith.subf %121, %136 : vector<8x128xf32>
      %138 = arith.mulf %39, %137 : vector<8x128xf32>
      %cst_70 = arith.constant 4.000000e+00 : f32
      %139 = vector.broadcast %cst_70 : f32 to vector<8x128xf32>
      %140 = arith.subf %139, %121 : vector<8x128xf32>
      %141 = arith.mulf %47, %140 : vector<8x128xf32>
      %142 = arith.addf %138, %141 : vector<8x128xf32>
      %cst_71 = arith.constant 3.000000e+00 : f32
      %143 = vector.broadcast %cst_71 : f32 to vector<8x128xf32>
      %144 = arith.subf %121, %143 : vector<8x128xf32>
      %145 = arith.mulf %47, %144 : vector<8x128xf32>
      %cst_72 = arith.constant 5.000000e+00 : f32
      %146 = vector.broadcast %cst_72 : f32 to vector<8x128xf32>
      %147 = arith.subf %146, %121 : vector<8x128xf32>
      %148 = arith.mulf %55, %147 : vector<8x128xf32>
      %149 = arith.addf %145, %148 : vector<8x128xf32>
      %cst_73 = arith.constant 4.000000e+00 : f32
      %150 = vector.broadcast %cst_73 : f32 to vector<8x128xf32>
      %151 = arith.subf %121, %150 : vector<8x128xf32>
      %152 = arith.mulf %55, %151 : vector<8x128xf32>
      %cst_74 = arith.constant 6.000000e+00 : f32
      %153 = vector.broadcast %cst_74 : f32 to vector<8x128xf32>
      %154 = arith.subf %153, %121 : vector<8x128xf32>
      %155 = arith.mulf %63, %154 : vector<8x128xf32>
      %156 = arith.addf %152, %155 : vector<8x128xf32>
      %cst_75 = arith.constant 5.000000e+00 : f32
      %157 = vector.broadcast %cst_75 : f32 to vector<8x128xf32>
      %158 = arith.subf %121, %157 : vector<8x128xf32>
      %159 = arith.mulf %63, %158 : vector<8x128xf32>
      %cst_76 = arith.constant 1.300000e+01 : f32
      %160 = vector.broadcast %cst_76 : f32 to vector<8x128xf32>
      %161 = arith.mulf %7, %160 : vector<8x128xf32>
      %cst_77 = arith.constant 7.000000e+00 : f32
      %162 = vector.broadcast %cst_77 : f32 to vector<8x128xf32>
      %163 = arith.subf %162, %161 : vector<8x128xf32>
      %164 = arith.mulf %71, %163 : vector<8x128xf32>
      %165 = arith.addf %159, %164 : vector<8x128xf32>
      %cst_78 = arith.constant 6.000000e+00 : f32
      %166 = vector.broadcast %cst_78 : f32 to vector<8x128xf32>
      %167 = arith.subf %161, %166 : vector<8x128xf32>
      %168 = arith.mulf %71, %167 : vector<8x128xf32>
      %cst_79 = arith.constant 1.300000e+01 : f32
      %169 = vector.broadcast %cst_79 : f32 to vector<8x128xf32>
      %170 = arith.mulf %7, %169 : vector<8x128xf32>
      %cst_80 = arith.constant 8.000000e+00 : f32
      %171 = vector.broadcast %cst_80 : f32 to vector<8x128xf32>
      %172 = arith.subf %171, %170 : vector<8x128xf32>
      %173 = arith.mulf %79, %172 : vector<8x128xf32>
      %174 = arith.addf %168, %173 : vector<8x128xf32>
      %cst_81 = arith.constant 7.000000e+00 : f32
      %175 = vector.broadcast %cst_81 : f32 to vector<8x128xf32>
      %176 = arith.subf %170, %175 : vector<8x128xf32>
      %177 = arith.mulf %79, %176 : vector<8x128xf32>
      %cst_82 = arith.constant 9.000000e+00 : f32
      %178 = vector.broadcast %cst_82 : f32 to vector<8x128xf32>
      %179 = arith.subf %178, %161 : vector<8x128xf32>
      %180 = arith.mulf %87, %179 : vector<8x128xf32>
      %181 = arith.addf %177, %180 : vector<8x128xf32>
      %cst_83 = arith.constant 8.000000e+00 : f32
      %182 = vector.broadcast %cst_83 : f32 to vector<8x128xf32>
      %183 = arith.subf %161, %182 : vector<8x128xf32>
      %184 = arith.mulf %87, %183 : vector<8x128xf32>
      %cst_84 = arith.constant 1.000000e+01 : f32
      %185 = vector.broadcast %cst_84 : f32 to vector<8x128xf32>
      %186 = arith.subf %185, %170 : vector<8x128xf32>
      %187 = arith.mulf %95, %186 : vector<8x128xf32>
      %188 = arith.addf %184, %187 : vector<8x128xf32>
      %cst_85 = arith.constant 9.000000e+00 : f32
      %189 = vector.broadcast %cst_85 : f32 to vector<8x128xf32>
      %190 = arith.subf %170, %189 : vector<8x128xf32>
      %191 = arith.mulf %95, %190 : vector<8x128xf32>
      %cst_86 = arith.constant 1.100000e+01 : f32
      %192 = vector.broadcast %cst_86 : f32 to vector<8x128xf32>
      %193 = arith.subf %192, %161 : vector<8x128xf32>
      %194 = arith.mulf %103, %193 : vector<8x128xf32>
      %195 = arith.addf %191, %194 : vector<8x128xf32>
      %cst_87 = arith.constant 1.000000e+01 : f32
      %196 = vector.broadcast %cst_87 : f32 to vector<8x128xf32>
      %197 = arith.subf %161, %196 : vector<8x128xf32>
      %198 = arith.mulf %103, %197 : vector<8x128xf32>
      %cst_88 = arith.constant 1.200000e+01 : f32
      %199 = vector.broadcast %cst_88 : f32 to vector<8x128xf32>
      %200 = arith.subf %199, %170 : vector<8x128xf32>
      %201 = arith.mulf %111, %200 : vector<8x128xf32>
      %202 = arith.addf %198, %201 : vector<8x128xf32>
      %cst_89 = arith.constant 1.100000e+01 : f32
      %203 = vector.broadcast %cst_89 : f32 to vector<8x128xf32>
      %204 = arith.subf %170, %203 : vector<8x128xf32>
      %205 = arith.mulf %111, %204 : vector<8x128xf32>
      %cst_90 = arith.constant 1.300000e+01 : f32
      %206 = vector.broadcast %cst_90 : f32 to vector<8x128xf32>
      %207 = arith.subf %206, %161 : vector<8x128xf32>
      %208 = arith.mulf %119, %207 : vector<8x128xf32>
      %209 = arith.addf %205, %208 : vector<8x128xf32>
      %cst_91 = arith.constant 6.500000e+00 : f32
      %210 = vector.broadcast %cst_91 : f32 to vector<8x128xf32>
      %211 = arith.mulf %7, %210 : vector<8x128xf32>
      %cst_92 = arith.constant 0.000000e+00 : f32
      %212 = vector.broadcast %cst_92 : f32 to vector<8x128xf32>
      %213 = arith.subf %211, %212 : vector<8x128xf32>
      %214 = arith.mulf %128, %213 : vector<8x128xf32>
      %cst_93 = arith.constant 1.500000e+00 : f32
      %215 = vector.broadcast %cst_93 : f32 to vector<8x128xf32>
      %216 = arith.subf %215, %211 : vector<8x128xf32>
      %217 = arith.mulf %135, %216 : vector<8x128xf32>
      %218 = arith.addf %214, %217 : vector<8x128xf32>
      %cst_94 = arith.constant 5.000000e-01 : f32
      %219 = vector.broadcast %cst_94 : f32 to vector<8x128xf32>
      %220 = arith.subf %211, %219 : vector<8x128xf32>
      %221 = arith.mulf %135, %220 : vector<8x128xf32>
      %cst_95 = arith.constant 2.000000e+00 : f32
      %222 = vector.broadcast %cst_95 : f32 to vector<8x128xf32>
      %223 = arith.subf %222, %211 : vector<8x128xf32>
      %224 = arith.mulf %142, %223 : vector<8x128xf32>
      %225 = arith.addf %221, %224 : vector<8x128xf32>
      %cst_96 = arith.constant 1.000000e+00 : f32
      %226 = vector.broadcast %cst_96 : f32 to vector<8x128xf32>
      %227 = arith.subf %211, %226 : vector<8x128xf32>
      %228 = arith.mulf %142, %227 : vector<8x128xf32>
      %cst_97 = arith.constant 2.500000e+00 : f32
      %229 = vector.broadcast %cst_97 : f32 to vector<8x128xf32>
      %230 = arith.subf %229, %211 : vector<8x128xf32>
      %231 = arith.mulf %149, %230 : vector<8x128xf32>
      %232 = arith.addf %228, %231 : vector<8x128xf32>
      %cst_98 = arith.constant 1.500000e+00 : f32
      %233 = vector.broadcast %cst_98 : f32 to vector<8x128xf32>
      %234 = arith.subf %211, %233 : vector<8x128xf32>
      %235 = arith.mulf %149, %234 : vector<8x128xf32>
      %cst_99 = arith.constant 3.000000e+00 : f32
      %236 = vector.broadcast %cst_99 : f32 to vector<8x128xf32>
      %237 = arith.subf %236, %211 : vector<8x128xf32>
      %238 = arith.mulf %156, %237 : vector<8x128xf32>
      %239 = arith.addf %235, %238 : vector<8x128xf32>
      %cst_100 = arith.constant 2.000000e+00 : f32
      %240 = vector.broadcast %cst_100 : f32 to vector<8x128xf32>
      %241 = arith.subf %211, %240 : vector<8x128xf32>
      %242 = arith.mulf %156, %241 : vector<8x128xf32>
      %cst_101 = arith.constant 6.500000e+00 : f32
      %243 = vector.broadcast %cst_101 : f32 to vector<8x128xf32>
      %244 = arith.mulf %7, %243 : vector<8x128xf32>
      %cst_102 = arith.constant 3.500000e+00 : f32
      %245 = vector.broadcast %cst_102 : f32 to vector<8x128xf32>
      %246 = arith.subf %245, %244 : vector<8x128xf32>
      %247 = arith.mulf %165, %246 : vector<8x128xf32>
      %248 = arith.addf %242, %247 : vector<8x128xf32>
      %cst_103 = arith.constant 2.500000e+00 : f32
      %249 = vector.broadcast %cst_103 : f32 to vector<8x128xf32>
      %250 = arith.subf %244, %249 : vector<8x128xf32>
      %251 = arith.mulf %165, %250 : vector<8x128xf32>
      %cst_104 = arith.constant 4.000000e+00 : f32
      %252 = vector.broadcast %cst_104 : f32 to vector<8x128xf32>
      %253 = arith.subf %252, %211 : vector<8x128xf32>
      %254 = arith.mulf %174, %253 : vector<8x128xf32>
      %255 = arith.addf %251, %254 : vector<8x128xf32>
      %cst_105 = arith.constant 3.000000e+00 : f32
      %256 = vector.broadcast %cst_105 : f32 to vector<8x128xf32>
      %257 = arith.subf %211, %256 : vector<8x128xf32>
      %258 = arith.mulf %174, %257 : vector<8x128xf32>
      %cst_106 = arith.constant 4.500000e+00 : f32
      %259 = vector.broadcast %cst_106 : f32 to vector<8x128xf32>
      %260 = arith.subf %259, %211 : vector<8x128xf32>
      %261 = arith.mulf %181, %260 : vector<8x128xf32>
      %262 = arith.addf %258, %261 : vector<8x128xf32>
      %cst_107 = arith.constant 3.500000e+00 : f32
      %263 = vector.broadcast %cst_107 : f32 to vector<8x128xf32>
      %264 = arith.subf %211, %263 : vector<8x128xf32>
      %265 = arith.mulf %181, %264 : vector<8x128xf32>
      %cst_108 = arith.constant 5.000000e+00 : f32
      %266 = vector.broadcast %cst_108 : f32 to vector<8x128xf32>
      %267 = arith.subf %266, %211 : vector<8x128xf32>
      %268 = arith.mulf %188, %267 : vector<8x128xf32>
      %269 = arith.addf %265, %268 : vector<8x128xf32>
      %cst_109 = arith.constant 4.000000e+00 : f32
      %270 = vector.broadcast %cst_109 : f32 to vector<8x128xf32>
      %271 = arith.subf %211, %270 : vector<8x128xf32>
      %272 = arith.mulf %188, %271 : vector<8x128xf32>
      %cst_110 = arith.constant 5.500000e+00 : f32
      %273 = vector.broadcast %cst_110 : f32 to vector<8x128xf32>
      %274 = arith.subf %273, %211 : vector<8x128xf32>
      %275 = arith.mulf %195, %274 : vector<8x128xf32>
      %276 = arith.addf %272, %275 : vector<8x128xf32>
      %cst_111 = arith.constant 4.500000e+00 : f32
      %277 = vector.broadcast %cst_111 : f32 to vector<8x128xf32>
      %278 = arith.subf %211, %277 : vector<8x128xf32>
      %279 = arith.mulf %195, %278 : vector<8x128xf32>
      %cst_112 = arith.constant 6.000000e+00 : f32
      %280 = vector.broadcast %cst_112 : f32 to vector<8x128xf32>
      %281 = arith.subf %280, %211 : vector<8x128xf32>
      %282 = arith.mulf %202, %281 : vector<8x128xf32>
      %283 = arith.addf %279, %282 : vector<8x128xf32>
      %cst_113 = arith.constant 5.000000e+00 : f32
      %284 = vector.broadcast %cst_113 : f32 to vector<8x128xf32>
      %285 = arith.subf %211, %284 : vector<8x128xf32>
      %286 = arith.mulf %202, %285 : vector<8x128xf32>
      %cst_114 = arith.constant 6.500000e+00 : f32
      %287 = vector.broadcast %cst_114 : f32 to vector<8x128xf32>
      %288 = arith.subf %287, %211 : vector<8x128xf32>
      %289 = arith.mulf %209, %288 : vector<8x128xf32>
      %290 = arith.addf %286, %289 : vector<8x128xf32>
      %cst_115 = arith.constant 4.33333349 : f32
      %291 = vector.broadcast %cst_115 : f32 to vector<8x128xf32>
      %292 = arith.mulf %7, %291 : vector<8x128xf32>
      %cst_116 = arith.constant 0.000000e+00 : f32
      %293 = vector.broadcast %cst_116 : f32 to vector<8x128xf32>
      %294 = arith.subf %292, %293 : vector<8x128xf32>
      %295 = arith.mulf %218, %294 : vector<8x128xf32>
      %cst_117 = arith.constant 1.33333337 : f32
      %296 = vector.broadcast %cst_117 : f32 to vector<8x128xf32>
      %297 = arith.subf %296, %292 : vector<8x128xf32>
      %298 = arith.mulf %225, %297 : vector<8x128xf32>
      %299 = arith.addf %295, %298 : vector<8x128xf32>
      %cst_118 = arith.constant 0.333333343 : f32
      %300 = vector.broadcast %cst_118 : f32 to vector<8x128xf32>
      %301 = arith.subf %292, %300 : vector<8x128xf32>
      %302 = arith.mulf %225, %301 : vector<8x128xf32>
      %cst_119 = arith.constant 1.66666663 : f32
      %303 = vector.broadcast %cst_119 : f32 to vector<8x128xf32>
      %304 = arith.subf %303, %292 : vector<8x128xf32>
      %305 = arith.mulf %232, %304 : vector<8x128xf32>
      %306 = arith.addf %302, %305 : vector<8x128xf32>
      %cst_120 = arith.constant 0.666666686 : f32
      %307 = vector.broadcast %cst_120 : f32 to vector<8x128xf32>
      %308 = arith.subf %292, %307 : vector<8x128xf32>
      %309 = arith.mulf %232, %308 : vector<8x128xf32>
      %cst_121 = arith.constant 2.000000e+00 : f32
      %310 = vector.broadcast %cst_121 : f32 to vector<8x128xf32>
      %311 = arith.subf %310, %292 : vector<8x128xf32>
      %312 = arith.mulf %239, %311 : vector<8x128xf32>
      %313 = arith.addf %309, %312 : vector<8x128xf32>
      %cst_122 = arith.constant 1.000000e+00 : f32
      %314 = vector.broadcast %cst_122 : f32 to vector<8x128xf32>
      %315 = arith.subf %292, %314 : vector<8x128xf32>
      %316 = arith.mulf %239, %315 : vector<8x128xf32>
      %cst_123 = arith.constant 4.33333349 : f32
      %317 = vector.broadcast %cst_123 : f32 to vector<8x128xf32>
      %318 = arith.mulf %7, %317 : vector<8x128xf32>
      %cst_124 = arith.constant 2.33333325 : f32
      %319 = vector.broadcast %cst_124 : f32 to vector<8x128xf32>
      %320 = arith.subf %319, %318 : vector<8x128xf32>
      %321 = arith.mulf %248, %320 : vector<8x128xf32>
      %322 = arith.addf %316, %321 : vector<8x128xf32>
      %cst_125 = arith.constant 1.33333337 : f32
      %323 = vector.broadcast %cst_125 : f32 to vector<8x128xf32>
      %324 = arith.subf %318, %323 : vector<8x128xf32>
      %325 = arith.mulf %248, %324 : vector<8x128xf32>
      %cst_126 = arith.constant 2.66666675 : f32
      %326 = vector.broadcast %cst_126 : f32 to vector<8x128xf32>
      %327 = arith.subf %326, %292 : vector<8x128xf32>
      %328 = arith.mulf %255, %327 : vector<8x128xf32>
      %329 = arith.addf %325, %328 : vector<8x128xf32>
      %cst_127 = arith.constant 1.66666663 : f32
      %330 = vector.broadcast %cst_127 : f32 to vector<8x128xf32>
      %331 = arith.subf %292, %330 : vector<8x128xf32>
      %332 = arith.mulf %255, %331 : vector<8x128xf32>
      %cst_128 = arith.constant 3.000000e+00 : f32
      %333 = vector.broadcast %cst_128 : f32 to vector<8x128xf32>
      %334 = arith.subf %333, %318 : vector<8x128xf32>
      %335 = arith.mulf %262, %334 : vector<8x128xf32>
      %336 = arith.addf %332, %335 : vector<8x128xf32>
      %cst_129 = arith.constant 2.000000e+00 : f32
      %337 = vector.broadcast %cst_129 : f32 to vector<8x128xf32>
      %338 = arith.subf %318, %337 : vector<8x128xf32>
      %339 = arith.mulf %262, %338 : vector<8x128xf32>
      %cst_130 = arith.constant 4.33333349 : f32
      %340 = vector.broadcast %cst_130 : f32 to vector<8x128xf32>
      %341 = arith.mulf %7, %340 : vector<8x128xf32>
      %cst_131 = arith.constant 3.33333325 : f32
      %342 = vector.broadcast %cst_131 : f32 to vector<8x128xf32>
      %343 = arith.subf %342, %341 : vector<8x128xf32>
      %344 = arith.mulf %269, %343 : vector<8x128xf32>
      %345 = arith.addf %339, %344 : vector<8x128xf32>
      %cst_132 = arith.constant 2.33333325 : f32
      %346 = vector.broadcast %cst_132 : f32 to vector<8x128xf32>
      %347 = arith.subf %341, %346 : vector<8x128xf32>
      %348 = arith.mulf %269, %347 : vector<8x128xf32>
      %cst_133 = arith.constant 3.66666675 : f32
      %349 = vector.broadcast %cst_133 : f32 to vector<8x128xf32>
      %350 = arith.subf %349, %318 : vector<8x128xf32>
      %351 = arith.mulf %276, %350 : vector<8x128xf32>
      %352 = arith.addf %348, %351 : vector<8x128xf32>
      %cst_134 = arith.constant 2.66666675 : f32
      %353 = vector.broadcast %cst_134 : f32 to vector<8x128xf32>
      %354 = arith.subf %318, %353 : vector<8x128xf32>
      %355 = arith.mulf %276, %354 : vector<8x128xf32>
      %cst_135 = arith.constant 4.000000e+00 : f32
      %356 = vector.broadcast %cst_135 : f32 to vector<8x128xf32>
      %357 = arith.subf %356, %341 : vector<8x128xf32>
      %358 = arith.mulf %283, %357 : vector<8x128xf32>
      %359 = arith.addf %355, %358 : vector<8x128xf32>
      %cst_136 = arith.constant 3.000000e+00 : f32
      %360 = vector.broadcast %cst_136 : f32 to vector<8x128xf32>
      %361 = arith.subf %341, %360 : vector<8x128xf32>
      %362 = arith.mulf %283, %361 : vector<8x128xf32>
      %cst_137 = arith.constant 4.33333349 : f32
      %363 = vector.broadcast %cst_137 : f32 to vector<8x128xf32>
      %364 = arith.subf %363, %318 : vector<8x128xf32>
      %365 = arith.mulf %290, %364 : vector<8x128xf32>
      %366 = arith.addf %362, %365 : vector<8x128xf32>
      %c0_138 = arith.constant 0 : index
      %c128 = arith.constant 128 : index
      %367 = vector.load %arg5[%c0_138, %c128] : memref<8x1408xf32, #tpu.memory_space<vmem>>, vector<8x128xf32>
      tpu.vector_store %arg5[%c0_138, %c128], %299 {strides = array<i32>} : memref<8x1408xf32, #tpu.memory_space<vmem>>, vector<8x128xf32>,
      %c0_139 = arith.constant 0 : index
      %c256 = arith.constant 256 : index
      %368 = vector.load %arg5[%c0_139, %c256] : memref<8x1408xf32, #tpu.memory_space<vmem>>, vector<8x128xf32>
      tpu.vector_store %arg5[%c0_139, %c256], %306 {strides = array<i32>} : memref<8x1408xf32, #tpu.memory_space<vmem>>, vector<8x128xf32>,
      %c0_140 = arith.constant 0 : index
      %c384 = arith.constant 384 : index
      %369 = vector.load %arg5[%c0_140, %c384] : memref<8x1408xf32, #tpu.memory_space<vmem>>, vector<8x128xf32>
      tpu.vector_store %arg5[%c0_140, %c384], %313 {strides = array<i32>} : memref<8x1408xf32, #tpu.memory_space<vmem>>, vector<8x128xf32>,
      %c0_141 = arith.constant 0 : index
      %c512 = arith.constant 512 : index
      %370 = vector.load %arg5[%c0_141, %c512] : memref<8x1408xf32, #tpu.memory_space<vmem>>, vector<8x128xf32>
      tpu.vector_store %arg5[%c0_141, %c512], %322 {strides = array<i32>} : memref<8x1408xf32, #tpu.memory_space<vmem>>, vector<8x128xf32>,
      %c0_142 = arith.constant 0 : index
      %c640 = arith.constant 640 : index
      %371 = vector.load %arg5[%c0_142, %c640] : memref<8x1408xf32, #tpu.memory_space<vmem>>, vector<8x128xf32>
      tpu.vector_store %arg5[%c0_142, %c640], %329 {strides = array<i32>} : memref<8x1408xf32, #tpu.memory_space<vmem>>, vector<8x128xf32>,
      %c0_143 = arith.constant 0 : index
      %c768 = arith.constant 768 : index
      %372 = vector.load %arg5[%c0_143, %c768] : memref<8x1408xf32, #tpu.memory_space<vmem>>, vector<8x128xf32>
      tpu.vector_store %arg5[%c0_143, %c768], %336 {strides = array<i32>} : memref<8x1408xf32, #tpu.memory_space<vmem>>, vector<8x128xf32>,
      %c0_144 = arith.constant 0 : index
      %c896 = arith.constant 896 : index
      %373 = vector.load %arg5[%c0_144, %c896] : memref<8x1408xf32, #tpu.memory_space<vmem>>, vector<8x128xf32>
      tpu.vector_store %arg5[%c0_144, %c896], %345 {strides = array<i32>} : memref<8x1408xf32, #tpu.memory_space<vmem>>, vector<8x128xf32>,
      %c0_145 = arith.constant 0 : index
      %c1024 = arith.constant 1024 : index
      %374 = vector.load %arg5[%c0_145, %c1024] : memref<8x1408xf32, #tpu.memory_space<vmem>>, vector<8x128xf32>
      tpu.vector_store %arg5[%c0_145, %c1024], %352 {strides = array<i32>} : memref<8x1408xf32, #tpu.memory_space<vmem>>, vector<8x128xf32>,
      %c0_146 = arith.constant 0 : index
      %c1152 = arith.constant 1152 : index
      %375 = vector.load %arg5[%c0_146, %c1152] : memref<8x1408xf32, #tpu.memory_space<vmem>>, vector<8x128xf32>
      tpu.vector_store %arg5[%c0_146, %c1152], %359 {strides = array<i32>} : memref<8x1408xf32, #tpu.memory_space<vmem>>, vector<8x128xf32>,
      %c0_147 = arith.constant 0 : index
      %c1280 = arith.constant 1280 : index
      %376 = vector.load %arg5[%c0_147, %c1280] : memref<8x1408xf32, #tpu.memory_space<vmem>>, vector<8x128xf32>
      tpu.vector_store %arg5[%c0_147, %c1280], %366 {strides = array<i32>} : memref<8x1408xf32, #tpu.memory_space<vmem>>, vector<8x128xf32>,
    } else {
    }
    %c0 = arith.constant 0 : index
    %c0_1 = arith.constant 0 : index
    %3 = vector.load %arg5[%c0, %c0_1] : memref<8x1408xf32, #tpu.memory_space<vmem>>, vector<8x1408xf32>
    %c0_2 = arith.constant 0 : index
    %c0_3 = arith.constant 0 : index
    %4 = vector.load %arg3[%c0_2, %c0_3] : memref<1408x128xf32, #tpu.memory_space<vmem>>, vector<1408x128xf32>
    %cst = arith.constant dense<0.000000e+00> : vector<8x128xf32>
    %5 = tpu.matmul %3, %4, %cst {dimension_numbers = #tpu.dot_dimension_numbers<[1], [0], [0], [1], [0, 0, 1, 1], [], []>} : vector<8x1408xf32>, vector<1408x128xf32>, vector<8x128xf32> -> vector<8x128xf32>
    %c0_4 = arith.constant 0 : index
    %c0_5 = arith.constant 0 : index
    %6 = vector.load %arg4[%c0_4, %c0_5] : memref<8x128xf32, #tpu.memory_space<vmem>>, vector<8x128xf32>
    tpu.vector_store %arg4[%c0_4, %c0_5], %5 {strides = array<i32>} : memref<8x128xf32, #tpu.memory_space<vmem>>, vector<8x128xf32>,
    return
  }
  func.func @transform_0(%arg0: i32, %arg1: i32) -> (i32, i32) {
    %c0_i32 = arith.constant 0 : i32
    %c0_i32_0 = arith.constant 0 : i32
    return %arg0, %c0_i32 : i32, i32
  }
  func.func @transform_1(%arg0: i32, %arg1: i32) -> (i32, i32) {
    %c0_i32 = arith.constant 0 : i32
    %c0_i32_0 = arith.constant 0 : i32
    return %c0_i32, %arg1 : i32, i32
  }
  func.func @transform_2(%arg0: i32, %arg1: i32) -> (i32, i32) {
    %c0_i32 = arith.constant 0 : i32
    return %arg0, %arg1 : i32, i32
  }
}

</mosaic_0001>

<bundles_post_ra>
// kernel: tpu_custom_call.1
= control target key start
LH: loop header
LB: loop body
LE: loop exit
PB: predicated region body
PF: predicated region fallthrough
CT: control target
= control target key end

     0   :  { %7 = vsyncpa [#allocation4], 0  ;;  %s1074_s0 = inlined_call_operand.hbm [shape: f32[8,128], index: 0, kind: input, shape index: {}]   ;;  %s1075_s1 = inlined_call_operand.hbm [shape: f32[1408,128], index: 1, kind: input, shape index: {}]   ;;  %s1076_s2 = inlined_call_operand.hbm [shape: f32[8,128], index: 2, kind: output, shape index: {}]  }
   0x1   :  { %8 = vsyncpa [#allocation7], 0 }
   0x2   :  { %9 = vsyncpa [#allocation5], 0  ;;  %s15_s11 = sshll.u32 %s1074_s0, 4  ;;  %s838_s12 = smov [#allocation3]   ;;  %s16_s11 = int_to_ptr.hbm [resolvable:$true] %s15_s11 }
   0x3   :  { %s17_s13 = sshll.u32 %s838_s12, 4  ;;  %s25_s16 = sshll.u32 %s1075_s1, 4  ;;  %s18_s13 = int_to_ptr.vmem [resolvable:$true] %s17_s13  ;;  %s26_s16 = int_to_ptr.hbm [resolvable:$true] %s25_s16 }
   0x4   :  { %20 = dma.hbm_to_vmem [thread:$0]  %s16_s11, 128, %s18_s13, [#allocation4]  }
   0x5   :  { %s839_s17 = smov [#allocation6]   ;;  %s840_s19 = smov 128  }
   0x6   :  { %s27_s18 = sshll.u32 %s839_s17, 4  ;;  %s841_s20 = smov 8   ;;  %s28_s18 = int_to_ptr.vmem [resolvable:$true] %s27_s18 }
   0x7   :  { %33 = dma.hbm_to_vmem [thread:$0]  %s26_s16, 22528, %s28_s18, [#allocation7], %s840_s19, %s840_s19, %s841_s20  }
   0x8   :  { %832 = dma.done.wait [#allocation4], 128  }
   0x9   :  { %833 = vsyncadd [#allocation4], 4294967168 }
   0xa   :  { %834 = dma.done.wait [#allocation7], 22528  }
   0xb   :  { %835 = vsyncadd [#allocation7], 4294944768  ;;  %v320_v0 = vld [vmem:[#allocation6 + $0x78] sm:$0xff]  ;;  %v319_v2 = vld [vmem:[#allocation6 + $0x70] sm:$0xff]  ;;  %s843_s0 = smov [#allocation8]   ;;  %s709_s23 = sshll.u32 %s1076_s2, 4  ;;  %s710_s23 = int_to_ptr.hbm [resolvable:$true] %s709_s23 }
   0xc   :  { %v352_v1 = vld [vmem:[#allocation6 + $0x178] sm:$0xff]  ;;  %481 = vmatpush.msra.mxu0 %v320_v0  ;;  %v351_v4 = vld [vmem:[#allocation6 + $0x170] sm:$0xff]  ;;  %v318_v5 = vld [vmem:[#allocation6 + $0x68] sm:$0xff]  ;;  %s707_s1 = sshll.u32 %s843_s0, 4  ;;  %s708_s1 = int_to_ptr.vmem [resolvable:$true] %s707_s1 }
   0xd   :  { %521 = vmatpush.msra.mxu2 %v352_v1  ;;  %v336_v3 = vld [vmem:[#allocation6 + $0xf8] sm:$0xff]  ;;  %v335_v6 = vld [vmem:[#allocation6 + $0xf0] sm:$0xff]  ;;  %v350_v7 = vld [vmem:[#allocation6 + $0x168] sm:$0xff] }
   0xe   :  { %501 = vmatpush.msra.mxu1 %v336_v3  ;;  %482 = vmatpush.msra.mxu0 %v319_v2  ;;  %v334_v8 = vld [vmem:[#allocation6 + $0xe8] sm:$0xff]  ;;  %v317_v9 = vld [vmem:[#allocation6 + $0x60] sm:$0xff]  ;;  %v368_v11 = vld [vmem:[#allocation6 + $0x1f8] sm:$0xff] }
   0xf   :  { %522 = vmatpush.msra.mxu2 %v351_v4  ;;  %v349_v10 = vld [vmem:[#allocation6 + $0x160] sm:$0xff]  ;;  %v316_v13 = vld [vmem:[#allocation6 + $0x58] sm:$0xff]  ;;  %541 = vmatpush.msra.mxu3 %v368_v11  ;;  %v367_v15 = vld [vmem:[#allocation6 + $0x1f0] sm:$0xff] }
  0x10   :  { %502 = vmatpush.msra.mxu1 %v335_v6  ;;  %483 = vmatpush.msra.mxu0 %v318_v5  ;;  %v333_v12 = vld [vmem:[#allocation6 + $0xe0] sm:$0xff]  ;;  %v348_v14 = vld [vmem:[#allocation6 + $0x158] sm:$0xff]  ;;  %v366_v17 = vld [vmem:[#allocation6 + $0x1e8] sm:$0xff] }
  0x11   :  { %523 = vmatpush.msra.mxu2 %v350_v7  ;;  %v332_v16 = vld [vmem:[#allocation6 + $0xd8] sm:$0xff]  ;;  %v315_v18 = vld [vmem:[#allocation6 + $0x50] sm:$0xff]  ;;  %542 = vmatpush.msra.mxu3 %v367_v15  ;;  %v365_v21 = vld [vmem:[#allocation6 + $0x1e0] sm:$0xff] }
  0x12   :  { %503 = vmatpush.msra.mxu1 %v334_v8  ;;  %484 = vmatpush.msra.mxu0 %v317_v9  ;;  %v347_v19 = vld [vmem:[#allocation6 + $0x150] sm:$0xff]  ;;  %v314_v22 = vld [vmem:[#allocation6 + $0x48] sm:$0xff]  ;;  %v364_v25 = vld [vmem:[#allocation6 + $0x1d8] sm:$0xff] }
  0x13   :  { %524 = vmatpush.msra.mxu2 %v349_v10  ;;  %v331_v20 = vld [vmem:[#allocation6 + $0xd0] sm:$0xff]  ;;  %v346_v23 = vld [vmem:[#allocation6 + $0x148] sm:$0xff]  ;;  %543 = vmatpush.msra.mxu3 %v366_v17  ;;  %v313_v26 = vld [vmem:[#allocation6 + $0x40] sm:$0xff] }
  0x14   :  { %504 = vmatpush.msra.mxu1 %v333_v12  ;;  %485 = vmatpush.msra.mxu0 %v316_v13  ;;  %v330_v24 = vld [vmem:[#allocation6 + $0xc8] sm:$0xff]  ;;  %v345_v27 = vld [vmem:[#allocation6 + $0x140] sm:$0xff]  ;;  %v363_v29 = vld [vmem:[#allocation6 + $0x1d0] sm:$0xff] }
  0x15   :  { %525 = vmatpush.msra.mxu2 %v348_v14  ;;  %544 = vmatpush.msra.mxu3 %v365_v21  ;;  %v329_v28 = vld [vmem:[#allocation6 + $0xc0] sm:$0xff]  ;;  %v312_v30 = vld [vmem:[#allocation6 + $0x38] sm:$0xff]  ;;  %v362_v33 = vld [vmem:[#allocation6 + $0x1c8] sm:$0xff] }
  0x16   :  { %505 = vmatpush.msra.mxu1 %v332_v16  ;;  %486 = vmatpush.msra.mxu0 %v315_v18  ;;  %v344_v31 = vld [vmem:[#allocation6 + $0x138] sm:$0xff]  ;;  %v311_v34 = vld [vmem:[#allocation6 + $0x30] sm:$0xff]  ;;  %v361_v37 = vld [vmem:[#allocation6 + $0x1c0] sm:$0xff] }
  0x17   :  { %526 = vmatpush.msra.mxu2 %v347_v19  ;;  %545 = vmatpush.msra.mxu3 %v364_v25  ;;  %v328_v32 = vld [vmem:[#allocation6 + $0xb8] sm:$0xff]  ;;  %v343_v35 = vld [vmem:[#allocation6 + $0x130] sm:$0xff]  ;;  %v310_v38 = vld [vmem:[#allocation6 + $0x28] sm:$0xff] }
  0x18   :  { %506 = vmatpush.msra.mxu1 %v331_v20  ;;  %487 = vmatpush.msra.mxu0 %v314_v22  ;;  %v327_v36 = vld [vmem:[#allocation6 + $0xb0] sm:$0xff]  ;;  %v342_v39 = vld [vmem:[#allocation6 + $0x128] sm:$0xff]  ;;  %v360_v41 = vld [vmem:[#allocation6 + $0x1b8] sm:$0xff] }
  0x19   :  { %527 = vmatpush.msra.mxu2 %v346_v23  ;;  %546 = vmatpush.msra.mxu3 %v363_v29  ;;  %v326_v40 = vld [vmem:[#allocation6 + $0xa8] sm:$0xff]  ;;  %v309_v42 = vld [vmem:[#allocation6 + $0x20] sm:$0xff]  ;;  %v359_v45 = vld [vmem:[#allocation6 + $0x1b0] sm:$0xff] }
  0x1a   :  { %507 = vmatpush.msra.mxu1 %v330_v24  ;;  %488 = vmatpush.msra.mxu0 %v313_v26  ;;  %v341_v43 = vld [vmem:[#allocation6 + $0x120] sm:$0xff]  ;;  %v308_v46 = vld [vmem:[#allocation6 + $0x18] sm:$0xff]  ;;  %v358_v49 = vld [vmem:[#allocation6 + $0x1a8] sm:$0xff] }
  0x1b   :  { %528 = vmatpush.msra.mxu2 %v345_v27  ;;  %547 = vmatpush.msra.mxu3 %v362_v33  ;;  %v325_v44 = vld [vmem:[#allocation6 + $0xa0] sm:$0xff]  ;;  %v340_v47 = vld [vmem:[#allocation6 + $0x118] sm:$0xff]  ;;  %v307_v50 = vld [vmem:[#allocation6 + $0x10] sm:$0xff] }
  0x1c   :  { %508 = vmatpush.msra.mxu1 %v329_v28  ;;  %489 = vmatpush.msra.mxu0 %v312_v30  ;;  %v324_v48 = vld [vmem:[#allocation6 + $0x98] sm:$0xff]  ;;  %v339_v51 = vld [vmem:[#allocation6 + $0x110] sm:$0xff]  ;;  %v357_v53 = vld [vmem:[#allocation6 + $0x1a0] sm:$0xff]  ;;  %v842_v28 = vmov 0.0  }
  0x1d   :  { %529 = vmatpush.msra.mxu2 %v344_v31  ;;  %548 = vmatpush.msra.mxu3 %v361_v37  ;;  %v323_v52 = vld [vmem:[#allocation6 + $0x90] sm:$0xff]  ;;  %v306_v54 = vld [vmem:[#allocation6 + $0x8] sm:$0xff]  ;;  %v356_v57 = vld [vmem:[#allocation6 + $0x198] sm:$0xff] }
  0x1e   :  { %509 = vmatpush.msra.mxu1 %v328_v32  ;;  %490 = vmatpush.msra.mxu0 %v311_v34  ;;  %v338_v55 = vld [vmem:[#allocation6 + $0x108] sm:$0xff]  ;;  %v305_v58 = vld [vmem:[#allocation6] sm:$0xff]  ;;  %v384_v60 = vld [vmem:[#allocation6 + $0x278] sm:$0xff] }
  0x1f   :  { %530 = vmatpush.msra.mxu2 %v343_v35  ;;  %549 = vmatpush.msra.mxu3 %v360_v41  ;;  %v322_v56 = vld [vmem:[#allocation6 + $0x88] sm:$0xff]  ;;  %v337_v59 = vld [vmem:[#allocation6 + $0x100] sm:$0xff]  ;;  %v416_v61 = vld [vmem:[#allocation6 + $0x378] sm:$0xff] }
  0x20   :  { %510 = vmatpush.msra.mxu1 %v327_v36  ;;  %491 = vmatpush.msra.mxu0 %v310_v38  ;;  %v321_v62 = vld [vmem:[#allocation6 + $0x80] sm:$0xff]  ;;  %v355_v63 = vld [vmem:[#allocation6 + $0x190] sm:$0xff]  ;;  %v400_v1 = vld [vmem:[#allocation6 + $0x2f8] sm:$0xff] }
  0x21   :  { %531 = vmatpush.msra.mxu2 %v342_v39  ;;  %550 = vmatpush.msra.mxu3 %v359_v45  ;;  %v383_v0 = vld [vmem:[#allocation6 + $0x270] sm:$0xff]  ;;  %v354_v3 = vld [vmem:[#allocation6 + $0x188] sm:$0xff]  ;;  %v353_v7 = vld [vmem:[#allocation6 + $0x180] sm:$0xff] }
  0x22   :  { %511 = vmatpush.msra.mxu1 %v326_v40  ;;  %492 = vmatpush.msra.mxu0 %v309_v42  ;;  %v415_v2 = vld [vmem:[#allocation6 + $0x370] sm:$0xff]  ;;  %v382_v4 = vld [vmem:[#allocation6 + $0x268] sm:$0xff]  ;;  %v381_v8 = vld [vmem:[#allocation6 + $0x260] sm:$0xff] }
  0x23   :  { %532 = vmatpush.msra.mxu2 %v341_v43  ;;  %551 = vmatpush.msra.mxu3 %v358_v49  ;;  %v399_v5 = vld [vmem:[#allocation6 + $0x2f0] sm:$0xff]  ;;  %v414_v6 = vld [vmem:[#allocation6 + $0x368] sm:$0xff]  ;;  %v413_v10 = vld [vmem:[#allocation6 + $0x360] sm:$0xff] }
  0x24   :  { %512 = vmatpush.msra.mxu1 %v325_v44  ;;  %493 = vmatpush.msra.mxu0 %v308_v46  ;;  %v398_v9 = vld [vmem:[#allocation6 + $0x2e8] sm:$0xff]  ;;  %v380_v11 = vld [vmem:[#allocation6 + $0x258] sm:$0xff]  ;;  %v397_v13 = vld [vmem:[#allocation6 + $0x2e0] sm:$0xff] }
  0x25   :  { %533 = vmatpush.msra.mxu2 %v340_v47  ;;  %552 = vmatpush.msra.mxu3 %v357_v53  ;;  %v432_v12 = vld [vmem:[#allocation6 + $0x3f8] sm:$0xff]  ;;  %v379_v15 = vld [vmem:[#allocation6 + $0x250] sm:$0xff]  ;;  %v378_v19 = vld [vmem:[#allocation6 + $0x248] sm:$0xff] }
  0x26   :  { %513 = vmatpush.msra.mxu1 %v324_v48  ;;  %494 = vmatpush.msra.mxu0 %v307_v50  ;;  %v412_v14 = vld [vmem:[#allocation6 + $0x358] sm:$0xff]  ;;  %v411_v17 = vld [vmem:[#allocation6 + $0x350] sm:$0xff]  ;;  %v430_v21 = vld [vmem:[#allocation6 + $0x3e8] sm:$0xff] }
  0x27   :  { %534 = vmatpush.msra.mxu2 %v339_v51  ;;  %553 = vmatpush.msra.mxu3 %v356_v57  ;;  %v396_v16 = vld [vmem:[#allocation6 + $0x2d8] sm:$0xff]  ;;  %v431_v18 = vld [vmem:[#allocation6 + $0x3f0] sm:$0xff]  ;;  %v410_v23 = vld [vmem:[#allocation6 + $0x348] sm:$0xff] }
  0x28   :  { %514 = vmatpush.msra.mxu1 %v323_v52  ;;  %495 = vmatpush.msra.mxu0 %v306_v54  ;;  %v395_v20 = vld [vmem:[#allocation6 + $0x2d0] sm:$0xff]  ;;  %v865_v22 = vld [vmem:[#allocation3] sm:$0xff]  ;;  %v377_v24 = vld [vmem:[#allocation6 + $0x240] sm:$0xff] }
  0x29   :  { %535 = vmatpush.msra.mxu2 %v338_v55  ;;  %554 = vmatpush.msra.mxu3 %v355_v63  ;;  %vm71_vm0 = vcmp.ge.f32.partialorder %v865_v22, 0.07692308  ;;  %vm72_vm1 = vcmp.lt.f32.partialorder %v865_v22, 0.15384616  ;;  %vm75_vm2 = vcmp.ge.f32.partialorder %v865_v22, 0.15384616 }
  0x2a   :  { %515 = vmatpush.msra.mxu1 %v322_v56  ;;  %496 = vmatpush.msra.mxu0 %v305_v58  ;;  %vm73_vm3 = vmand %vm71_vm0, %vm72_vm1  ;;  %vm76_vm4 = vcmp.lt.f32.partialorder %v865_v22, 0.23076923  ;;  %vm79_vm5 = vcmp.ge.f32.partialorder %v865_v22, 0.23076923  ;;  %vm80_vm6 = vcmp.lt.f32.partialorder %v865_v22, 0.30769232 }
  0x2b   :  { %536 = vmatpush.msra.mxu2 %v337_v59  ;;  %555 = vmatpush.msra.mxu3 %v354_v3  ;;  %v429_v25 = vld [vmem:[#allocation6 + $0x3e0] sm:$0xff]  ;;  %vm77_vm7 = vmand %vm75_vm2, %vm76_vm4  ;;  %vm83_vm8 = vcmp.ge.f32.partialorder %v865_v22, 0.30769232  ;;  %vm84_vm9 = vcmp.lt.f32.partialorder %v865_v22, 0.3846154  ;;  %v876_v26 = vmul.f32 13.0, %v865_v22 }
  0x2c   :  { %561 = vmatpush.msrb.mxu0 %v384_v60  ;;  %516 = vmatpush.msra.mxu1 %v321_v62  ;;  %v394_v27 = vld [vmem:[#allocation6 + $0x2c8] sm:$0xff]  ;;  %v879_v29 = vsel %vm73_vm3, 1.0, %v842_v28  ;;  %v78_v30 = vsel %vm77_vm7, 1.0, %v842_v28  ;;  %vm81_vm10 = vmand %vm79_vm5, %vm80_vm6  ;;  %v885_v31 = vmul.f32 6.5, %v865_v22  ;;  %v888_v32 = vmul.f32 4.3333335, %v865_v22 }
  0x2d   :  { %601 = vmatpush.msrb.mxu2 %v416_v61  ;;  %556 = vmatpush.msra.mxu3 %v353_v7  ;;  %v409_v33 = vld [vmem:[#allocation6 + $0x340] sm:$0xff]  ;;  %v428_v34 = vld [vmem:[#allocation6 + $0x3d8] sm:$0xff]  ;;  %v82_v35 = vsel %vm81_vm10, 1.0, %v842_v28  ;;  %vm85_vm11 = vmand %vm83_vm8, %vm84_vm9  ;;  %v720_v36 = vadd.f32 -1.0, %v876_v26  ;;  %v126_v37 = vsub.f32 3.0, %v876_v26  ;;  %v721_v38 = vadd.f32 -2.0, %v876_v26 }
  0x2e   :  { %562 = vmatpush.msrb.mxu0 %v383_v0  ;;  %581 = vmatpush.msrb.mxu1 %v400_v1  ;;  %v376_v39 = vld [vmem:[#allocation6 + $0x238] sm:$0xff]  ;;  %v393_v40 = vld [vmem:[#allocation6 + $0x2c0] sm:$0xff]  ;;  %v86_v41 = vsel %vm85_vm11, 1.0, %v842_v28  ;;  %v131_v42 = vsub.f32 4.0, %v876_v26  ;;  %v722_v43 = vadd.f32 -3.0, %v876_v26  ;;  %v136_v44 = vsub.f32 5.0, %v876_v26 }
  0x2f   :  { %602 = vmatpush.msrb.mxu2 %v415_v2  ;;  %621 = vmatpush.msrb.mxu3 %v432_v12  ;;  %v408_v45 = vld [vmem:[#allocation6 + $0x338] sm:$0xff]  ;;  %v427_v46 = vld [vmem:[#allocation6 + $0x3d0] sm:$0xff]  ;;  %v125_v47 = vmul.f32 %v720_v36, %v879_v29  ;;  %v127_v48 = vmul.f32 %v126_v37, %v78_v30  ;;  %v130_v49 = vmul.f32 %v721_v38, %v78_v30  ;;  %v731_v50 = vadd.f32 -0.5, %v885_v31  ;;  %v426_v58 = vld [vmem:[#allocation6 + $0x3c8] sm:$0xff] }
  0x30   :  { %563 = vmatpush.msrb.mxu0 %v382_v4  ;;  %582 = vmatpush.msrb.mxu1 %v399_v5  ;;  %v375_v51 = vld [vmem:[#allocation6 + $0x230] sm:$0xff]  ;;  %v392_v52 = vld [vmem:[#allocation6 + $0x2b8] sm:$0xff]  ;;  %v132_v53 = vmul.f32 %v131_v42, %v82_v35  ;;  %v135_v54 = vmul.f32 %v722_v43, %v82_v35  ;;  %v137_v55 = vmul.f32 %v136_v44, %v86_v41  ;;  %v186_v56 = vsub.f32 2.0, %v885_v31  ;;  %v374_v63 = vld [vmem:[#allocation6 + $0x228] sm:$0xff] }
  0x31   :  { %603 = vmatpush.msrb.mxu2 %v414_v6  ;;  %622 = vmatpush.msrb.mxu3 %v431_v18  ;;  %v407_v57 = vld [vmem:[#allocation6 + $0x330] sm:$0xff]  ;;  %v905_v59 = vadd.f32 %v127_v48, %v125_v47  ;;  %v732_v60 = vadd.f32 -1.0, %v885_v31  ;;  %v191_v61 = vsub.f32 2.5, %v885_v31  ;;  %v741_v62 = vadd.f32 -0.33333334, %v888_v32  ;;  %v406_v1 = vld [vmem:[#allocation6 + $0x328] sm:$0xff] }
  0x32   :  { %564 = vmatpush.msrb.mxu0 %v381_v8  ;;  %583 = vmatpush.msrb.mxu1 %v398_v9  ;;  %v391_v0 = vld [vmem:[#allocation6 + $0x2b0] sm:$0xff]  ;;  %v133_v2 = vadd.f32 %v132_v53, %v130_v49  ;;  %v138_v3 = vadd.f32 %v137_v55, %v135_v54  ;;  %v241_v4 = vsub.f32 1.6666666, %v888_v32  ;;  %v47_v5 = vsub.f32 0.0, %v865_v22  ;;  %v425_v6 = vld [vmem:[#allocation6 + $0x3c0] sm:$0xff]  ;;  %v388_v36 = vld [vmem:[#allocation6 + $0x298] sm:$0xff] }
  0x33   :  { %604 = vmatpush.msrb.mxu2 %v413_v10  ;;  %623 = vmatpush.msrb.mxu3 %v430_v21  ;;  %v185_v7 = vmul.f32 %v731_v50, %v905_v59  ;;  %vm87_vm12 = vcmp.ge.f32.partialorder %v865_v22, 0.3846154  ;;  %vm88_vm13 = vcmp.lt.f32.partialorder %v865_v22, 0.46153846  ;;  %v723_v8 = vadd.f32 -4.0, %v876_v26  ;;  %v373_v9 = vld [vmem:[#allocation6 + $0x220] sm:$0xff] }
  0x34   :  { %565 = vmatpush.msrb.mxu0 %v380_v11  ;;  %584 = vmatpush.msrb.mxu1 %v397_v13  ;;  %v390_v10 = vld [vmem:[#allocation6 + $0x2a8] sm:$0xff]  ;;  %v187_v11 = vmul.f32 %v186_v56, %v133_v2  ;;  %v190_v12 = vmul.f32 %v732_v60, %v133_v2  ;;  %v192_v13 = vmul.f32 %v191_v61, %v138_v3  ;;  %vm89_vm14 = vmand %vm87_vm12, %vm88_vm13  ;;  %v389_v21 = vld [vmem:[#allocation6 + $0x2a0] sm:$0xff]  ;;  %vm67_vm15 = vcmp.ge.f32.partialorder %v865_v22, 0.0 }
  0x35   :  { %605 = vmatpush.msrb.mxu2 %v412_v14  ;;  %624 = vmatpush.msrb.mxu3 %v429_v25  ;;  %v48_v14 = vmul.f32 1.442695, %v47_v5  ;;  %v140_v18 = vmul.f32 %v723_v8, %v86_v41  ;;  %v733_v25 = vadd.f32 -1.5, %v885_v31  ;;  %v423_v30 = vld [vmem:[#allocation6 + $0x3b0] sm:$0xff]  ;;  %v370_v42 = vld [vmem:[#allocation6 + $0x208] sm:$0xff]  ;;  %v121_v49 = vsub.f32 2.0, %v876_v26 }
  0x36   :  { %566 = vmatpush.msrb.mxu0 %v379_v15  ;;  %585 = vmatpush.msrb.mxu1 %v396_v16  ;;  %v405_v15 = vld [vmem:[#allocation6 + $0x320] sm:$0xff]  ;;  %v424_v16 = vld [vmem:[#allocation6 + $0x3b8] sm:$0xff]  ;;  %v371_v35 = vld [vmem:[#allocation6 + $0x210] sm:$0xff]  ;;  %vm68_vm0 = vcmp.lt.f32.partialorder %v865_v22, 0.07692308  ;;  %v181_v50 = vsub.f32 1.5, %v885_v31 }
  0x37   :  { %606 = vmatpush.msrb.mxu2 %v411_v17  ;;  %625 = vmatpush.msrb.mxu3 %v428_v34  ;;  %v917_v17 = vsel %vm89_vm14, 1.0, %v842_v28  ;;  %756 = vpow2.f32 %v48_v14  ;;  %v196_v34 = vsub.f32 3.0, %v885_v31  ;;  %v403_v41 = vld [vmem:[#allocation6 + $0x310] sm:$0xff]  ;;  %v422_v43 = vld [vmem:[#allocation6 + $0x3a8] sm:$0xff]  ;;  %vm69_vm1 = vmand %vm67_vm15, %vm68_vm0  ;;  %vm91_vm2 = vcmp.ge.f32.partialorder %v865_v22, 0.46153846 }
  0x38   :  { %567 = vmatpush.msrb.mxu0 %v378_v19  ;;  %586 = vmatpush.msrb.mxu1 %v395_v20  ;;  %v141_v19 = vsub.f32 6.0, %v876_v26  ;;  %v372_v20 = vld [vmem:[#allocation6 + $0x218] sm:$0xff]  ;;  %v402_v47 = vld [vmem:[#allocation6 + $0x308] sm:$0xff]  ;;  %v70_v54 = vsel %vm69_vm1, 1.0, %v842_v28  ;;  %vm92_vm3 = vcmp.lt.f32.partialorder %v865_v22, 0.53846157  ;;  %v122_v61 = vmul.f32 %v121_v49, %v879_v29 }
  0x39   :  { %607 = vmatpush.msrb.mxu2 %v410_v23  ;;  %626 = vmatpush.msrb.mxu3 %v427_v46  ;;  %v920_v23 = vadd.f32 %v187_v11, %v185_v7  ;;  %v387_v46 = vld [vmem:[#allocation6 + $0x290] sm:$0xff]  ;;  %v369_v56 = vld [vmem:[#allocation6 + $0x200] sm:$0xff]  ;;  %v120_v60 = vmul.f32 %v876_v26, %v70_v54  ;;  %vm942_vm4 = vmand %vm91_vm2, %vm92_vm3  ;;  %vm95_vm5 = vcmp.ge.f32.partialorder %v865_v22, 0.53846157  ;;  %v182_v5 = vmul.f32 %v181_v50, %v905_v59 }
  0x3a   :  { %568 = vmatpush.msrb.mxu0 %v377_v24  ;;  %587 = vmatpush.msrb.mxu1 %v394_v27  ;;  %v193_v24 = vadd.f32 %v192_v13, %v190_v12  ;;  %v404_v27 = vld [vmem:[#allocation6 + $0x318] sm:$0xff]  ;;  %vm96_vm6 = vcmp.lt.f32.partialorder %v865_v22, 0.61538464  ;;  %vm99_vm7 = vcmp.ge.f32.partialorder %v865_v22, 0.61538464  ;;  %v385_v7 = vld [vmem:[#allocation6 + $0x280] sm:$0xff] }
  0x3b   :  { %608 = vmatpush.msrb.mxu2 %v409_v33  ;;  %627 = vmatpush.msrb.mxu3 %v426_v58  ;;  %v142_v33 = vmul.f32 %v141_v19, %v917_v17  ;;  %v240_v37 = vmul.f32 %v741_v62, %v920_v23  ;;  %v246_v58 = vsub.f32 2.0, %v888_v32  ;;  %v123_v29 = vadd.f32 %v122_v61, %v120_v60  ;;  %vm97_vm9 = vmand %vm95_vm5, %vm96_vm6  ;;  %v479_v12 = vld [vmem:[#allocation6 + $0x570] sm:$0xff]  ;;  %v464_v50 = vld [vmem:[#allocation6 + $0x4f8] sm:$0xff] }
  0x3c   :  { %569 = vmatpush.msrb.mxu0 %v376_v39  ;;  %588 = vmatpush.msrb.mxu1 %v393_v40  ;;  %v242_v38 = vmul.f32 %v241_v4, %v193_v24  ;;  %v724_v39 = vadd.f32 -5.0, %v876_v26  ;;  %v742_v40 = vadd.f32 -0.6666667, %v888_v32  ;;  %v420_v4 = vld [vmem:[#allocation6 + $0x398] sm:$0xff]  ;;  %vm100_vm8 = vcmp.lt.f32.partialorder %v865_v22, 0.6923077 }
  0x3d   :  { %609 = vmatpush.msrb.mxu2 %v408_v45  ;;  %628 = vmatpush.msrb.mxu3 %v425_v6  ;;  %v928_v44 = vadd.f32 %v142_v33, %v140_v18  ;;  %v195_v45 = vmul.f32 %v733_v25, %v138_v3  ;;  %v757_v55 = vpop.eup %756  ;;  %v480_v3 = vld [vmem:[#allocation6 + $0x578] sm:$0xff]  ;;  %v94_v59 = vsel %vm942_vm4, 1.0, %v842_v28  ;;  %v180_v11 = vmul.f32 %v885_v31, %v123_v29  ;;  %v419_v13 = vld [vmem:[#allocation6 + $0x390] sm:$0xff]  ;;  %vm101_vm11 = vmand %vm99_vm7, %vm100_vm8 }
  0x3e   :  { %570 = vmatpush.msrb.mxu0 %v375_v51  ;;  %589 = vmatpush.msrb.mxu1 %v392_v52  ;;  %v243_v48 = vadd.f32 %v242_v38, %v240_v37  ;;  %v236_v51 = vsub.f32 1.3333334, %v888_v32  ;;  %v421_v52 = vld [vmem:[#allocation6 + $0x3a0] sm:$0xff]  ;;  %v245_v2 = vmul.f32 %v742_v40, %v193_v24  ;;  %v145_v6 = vmul.f32 %v724_v39, %v917_v17  ;;  %v475_v62 = vld [vmem:[#allocation6 + $0x550] sm:$0xff] }
  0x3f   :  { %610 = vmatpush.msrb.mxu2 %v407_v57  ;;  %629 = vmatpush.msrb.mxu3 %v424_v16  ;;  %v197_v53 = vmul.f32 %v196_v34, %v928_v44  ;;  %v386_v57 = vld [vmem:[#allocation6 + $0x288] sm:$0xff]  ;;  %v146_v14 = vsub.f32 7.0, %v876_v26  ;;  %v98_v16 = vsel %vm97_vm9, 1.0, %v842_v28  ;;  %v975_v17 = vsel %vm101_vm11, 1.0, %v842_v28  ;;  %v477_v39 = vld [vmem:[#allocation6 + $0x560] sm:$0xff] }
  0x40   :  { %571 = vmatpush.msrb.mxu0 %v374_v63  ;;  %590 = vmatpush.msrb.mxu1 %v391_v0  ;;  %v401_v63 = vld [vmem:[#allocation6 + $0x300] sm:$0xff]  ;;  %v947_v0 = vadd.f32 1.0, %v757_v55  ;;  %v237_v8 = vmul.f32 %v236_v51, %v920_v23  ;;  %v725_v18 = vadd.f32 -6.0, %v876_v26  ;;  %v418_v23 = vld [vmem:[#allocation6 + $0x388] sm:$0xff]  ;;  %v151_v25 = vsub.f32 8.0, %v876_v26 }
  0x41   :  { %611 = vmatpush.msrb.mxu2 %v406_v1  ;;  %630 = vmatpush.msrb.mxu3 %v423_v30  ;;  %v949_v1 = vadd.f32 %v197_v53, %v195_v45  ;;  %v147_v24 = vmul.f32 %v146_v14, %v94_v59  ;;  %v726_v30 = vadd.f32 -7.0, %v876_v26  ;;  %v156_v33 = vsub.f32 9.0, %v876_v26  ;;  %v417_v40 = vld [vmem:[#allocation6 + $0x380] sm:$0xff] }
  0x42   :  { %572 = vmatpush.msrb.mxu0 %v373_v9  ;;  %591 = vmatpush.msrb.mxu1 %v390_v10  ;;  %758 = vrcp.f32 %v947_v0  ;;  %vm56_vm10 = vweird.f32 %v947_v0  ;;  %v60_v9 = vand.u32 2147483647, %v947_v0  ;;  %v735_v34 = vadd.f32 -2.5, %v885_v31  ;;  %v461_v14 = vld [vmem:[#allocation6 + $0x4e0] sm:$0xff] }
  0x43   :  { %612 = vmatpush.msrb.mxu2 %v405_v15  ;;  %631 = vmatpush.msrb.mxu3 %v422_v43  ;;  %v247_v10 = vmul.f32 %v246_v58, %v949_v1  ;;  %v62_v15 = vand.u32 2147483648, %v947_v0  ;;  %v152_v37 = vmul.f32 %v151_v25, %v98_v16  ;;  %v206_v38 = vsub.f32 4.0, %v885_v31 }
  0x44   :  { %573 = vmatpush.msrb.mxu0 %v372_v20  ;;  %592 = vmatpush.msrb.mxu1 %v389_v21  ;;  %v183_v20 = vadd.f32 %v182_v5, %v180_v11  ;;  %v478_v21 = vld [vmem:[#allocation6 + $0x568] sm:$0xff]  ;;  %v157_v43 = vmul.f32 %v156_v33, %v975_v17  ;;  %v736_v45 = vadd.f32 -3.0, %v885_v31  ;;  %vm991_vm12 = vcmp.eq.f32.partialorder %v60_v9, 8.507059e+37  ;;  %v448_v33 = vld [vmem:[#allocation6 + $0x478] sm:$0xff] }
  0x45   :  { %613 = vmatpush.msrb.mxu2 %v404_v27  ;;  %632 = vmatpush.msrb.mxu3 %v421_v52  ;;  %v248_v19 = vadd.f32 %v247_v10, %v245_v2  ;;  %v150_v27 = vmul.f32 %v725_v18, %v94_v59  ;;  %v476_v52 = vld [vmem:[#allocation6 + $0x558] sm:$0xff]  ;;  %v745_v55 = vadd.f32 -1.6666666, %v888_v32  ;;  %v734_v61 = vadd.f32 -2.0, %v885_v31 }
  0x46   :  { %574 = vmatpush.msrb.mxu0 %v371_v35  ;;  %593 = vmatpush.msrb.mxu1 %v388_v36  ;;  %v235_v35 = vmul.f32 %v888_v32, %v183_v20  ;;  %v148_v36 = vadd.f32 %v147_v24, %v145_v6  ;;  %v462_v6 = vld [vmem:[#allocation6 + $0x4e8] sm:$0xff]  ;;  %vm103_vm14 = vcmp.ge.f32.partialorder %v865_v22, 0.6923077  ;;  %v743_v11 = vadd.f32 -1.0, %v888_v32  ;;  %v473_v20 = vld [vmem:[#allocation6 + $0x540] sm:$0xff] }
  0x47   :  { %614 = vmatpush.msrb.mxu2 %v403_v41  ;;  %633 = vmatpush.msrb.mxu3 %v420_v4  ;;  %v153_v51 = vadd.f32 %v152_v37, %v150_v27  ;;  %v201_v4 = vsub.f32 3.5, %v885_v31  ;;  %vm104_vm0 = vcmp.lt.f32.partialorder %v865_v22, 0.7692308  ;;  %v251_v18 = vsub.f32 2.3333333, %v888_v32  ;;  %v460_v27 = vld [vmem:[#allocation6 + $0x4d8] sm:$0xff] }
  0x48   :  { %575 = vmatpush.msrb.mxu0 %v370_v42  ;;  %594 = vmatpush.msrb.mxu1 %v387_v46  ;;  %v984_v41 = vpop.eup %758  ;;  %v155_v42 = vmul.f32 %v726_v30, %v98_v16  ;;  %v211_v46 = vsub.f32 4.5, %v885_v31  ;;  %v238_v49 = vadd.f32 %v237_v8, %v235_v35  ;;  %v205_v54 = vmul.f32 %v735_v34, %v148_v36  ;;  %v474_v8 = vld [vmem:[#allocation6 + $0x548] sm:$0xff]  ;;  %vm105_vm1 = vmand %vm103_vm14, %vm104_vm0  ;;  %v472_v37 = vld [vmem:[#allocation6 + $0x538] sm:$0xff] }
  0x49   :  { %615 = vmatpush.msrb.mxu2 %v402_v47  ;;  %634 = vmatpush.msrb.mxu3 %v419_v13  ;;  %v52_v47 = vmul.f32 %v984_v41, %v947_v0  ;;  %vm57_vm13 = vweird.f32 %v984_v41  ;;  %v207_v58 = vmul.f32 %v206_v38, %v153_v51  ;;  %v210_v60 = vmul.f32 %v736_v45, %v153_v51 }
  0x4a   :  { %537 = vmatmul.f32.vlgmr.msra.gmra.mxu2 %v243_v48  ;;  %576 = vmatpush.msrb.mxu0 %v369_v56  ;;  %v158_v53 = vadd.f32 %v157_v43, %v155_v42  ;;  %vm1009_vm15 = vmor %vm56_vm10, %vm57_vm13  ;;  %v202_v10 = vmul.f32 %v201_v4, %v148_v36  ;;  %v727_v13 = vadd.f32 -8.0, %v876_v26  ;;  %v161_v0 = vsub.f32 10.0, %v876_v26  ;;  %v459_v42 = vld [vmem:[#allocation6 + $0x4d0] sm:$0xff]  ;;  %v458_v43 = vld [vmem:[#allocation6 + $0x4c8] sm:$0xff] }
  0x4b   :  { %595 = vmatpush.msrb.mxu1 %v386_v57  ;;  %616 = vmatpush.msrb.mxu2 %v401_v63  ;;  %v53_v56 = vsub.f32 1.0, %v52_v47  ;;  %v463_v57 = vld [vmem:[#allocation6 + $0x4f0] sm:$0xff]  ;;  %v63_v63 = vor.u32 1.1754944e-38, %v62_v15  ;;  %v1001_v29 = vadd.f32 %v207_v58, %v205_v54  ;;  %v737_v25 = vadd.f32 -3.5, %v885_v31  ;;  %v445_v4 = vld [vmem:[#allocation6 + $0x460] sm:$0xff] }
  0x4c   :  { %557 = vmatmul.f32.vlgmr.msra.gmra.mxu3 %v248_v19  ;;  %517 = vmatmul.f32.vlgmr.msra.gmra.mxu1 %v238_v49  ;;  %v212_v2 = vmul.f32 %v211_v46, %v158_v53  ;;  %v106_v19 = vsel %vm105_vm1, 1.0, %v842_v28  ;;  %v250_v35 = vmul.f32 %v743_v11, %v949_v1  ;;  %v728_v36 = vadd.f32 -9.0, %v876_v26  ;;  %v471_v48 = vld [vmem:[#allocation6 + $0x530] sm:$0xff] }
  0x4d   :  { %681 = vmatpush.msra.mxu2 %v480_v3  ;;  %596 = vmatpush.msrb.mxu1 %v385_v7  ;;  %v261_v3 = vsub.f32 3.0, %v888_v32  ;;  %v54_v5 = vmul.f32 %v984_v41, %v53_v56  ;;  %v200_v7 = vmul.f32 %v734_v61, %v928_v44  ;;  %v162_v24 = vmul.f32 %v161_v0, %v106_v19 }
  0x4e   :  { %635 = vmatpush.msrb.mxu3 %v418_v23  ;;  %v213_v9 = vadd.f32 %v212_v2, %v210_v60  ;;  %v160_v23 = vmul.f32 %v727_v13, %v975_v17  ;;  %v215_v17 = vmul.f32 %v737_v25, %v158_v53  ;;  %v746_v46 = vadd.f32 -2.0, %v888_v32  ;;  %v470_v53 = vld [vmem:[#allocation6 + $0x528] sm:$0xff]  ;;  %v457_v60 = vld [vmem:[#allocation6 + $0x4c0] sm:$0xff]  ;;  %v468_v13 = vld [vmem:[#allocation6 + $0x518] sm:$0xff] }
  0x4f   :  { %682 = vmatpush.msra.mxu2 %v479_v12  ;;  %661 = vmatpush.msra.mxu1 %v464_v50  ;;  %v55_v44 = vadd.f32 %v984_v41, %v54_v5  ;;  %v260_v12 = vmul.f32 %v745_v55, %v1001_v29  ;;  %v203_v16 = vadd.f32 %v202_v10, %v200_v7  ;;  %v266_v1 = vsub.f32 3.3333333, %v888_v32  ;;  %v446_v55 = vld [vmem:[#allocation6 + $0x468] sm:$0xff]  ;;  %v456_v7 = vld [vmem:[#allocation6 + $0x4b8] sm:$0xff]  ;;  %v455_v10 = vld [vmem:[#allocation6 + $0x4b0] sm:$0xff] }
  0x50   :  { %636 = vmatpush.msrb.mxu3 %v417_v40  ;;  %v262_v15 = vmul.f32 %v261_v3, %v213_v9  ;;  %v1031_v40 = vadd.f32 %v162_v24, %v160_v23  ;;  %v744_v47 = vadd.f32 -1.3333334, %v888_v32  ;;  %v256_v50 = vsub.f32 2.6666667, %v888_v32  ;;  %v467_v24 = vld [vmem:[#allocation6 + $0x510] sm:$0xff] }
  0x51   :  { %683 = vmatpush.msra.mxu2 %v478_v21  ;;  %662 = vmatpush.msra.mxu1 %v463_v57  ;;  %v59_v21 = vsel %vm1009_vm15, %v984_v41, %v55_v44  ;;  %v216_v41 = vsub.f32 5.0, %v885_v31  ;;  %v252_v45 = vmul.f32 %v251_v18, %v203_v16  ;;  %vm107_vm2 = vcmp.ge.f32.partialorder %v865_v22, 0.7692308  ;;  %v454_v18 = vld [vmem:[#allocation6 + $0x4a8] sm:$0xff] }
  0x52   :  { %v64_v30 = vsel %vm991_vm12, %v63_v63, %v59_v21  ;;  %v263_v34 = vadd.f32 %v262_v15, %v260_v12  ;;  %vm108_vm3 = vcmp.lt.f32.partialorder %v865_v22, 0.84615386  ;;  %v165_v51 = vmul.f32 %v728_v36, %v106_v19  ;;  %v469_v63 = vld [vmem:[#allocation6 + $0x520] sm:$0xff] }
  0x53   :  { %684 = vmatpush.msra.mxu2 %v477_v39  ;;  %663 = vmatpush.msra.mxu1 %v462_v6  ;;  %v65_v38 = vmul.f32 %v64_v30, %v865_v22  ;;  %v447_v39 = vld [vmem:[#allocation6 + $0x470] sm:$0xff]  ;;  %v217_v49 = vmul.f32 %v216_v41, %v1031_v40  ;;  %vm109_vm4 = vmand %vm107_vm2, %vm108_vm3  ;;  %v166_v54 = vsub.f32 11.0, %v876_v26  ;;  %v265_v57 = vmul.f32 %v746_v46, %v213_v9  ;;  %v444_v9 = vld [vmem:[#allocation6 + $0x458] sm:$0xff] }
  0x54   :  { %617 = vmatmul.f32.vlgmr.msrb.gmra.mxu2 %v263_v34  ;;  %v257_v58 = vmul.f32 %v256_v50, %v1001_v29  ;;  %v110_v61 = vsel %vm109_vm4, 1.0, %v842_v28  ;;  %v738_v3 = vadd.f32 -4.0, %v885_v31  ;;  %vm111_vm5 = vcmp.ge.f32.partialorder %v865_v22, 0.84615386  ;;  %v465_v46 = vld [vmem:[#allocation6 + $0x500] sm:$0xff] }
  0x55   :  { %685 = vmatpush.msra.mxu2 %v476_v52  ;;  %664 = vmatpush.msra.mxu1 %v461_v14  ;;  %v255_v52 = vmul.f32 %v744_v47, %v203_v16  ;;  %v1042_v56 = vadd.f32 %v217_v49, %v215_v17  ;;  %v167_v2 = vmul.f32 %v166_v54, %v110_v61  ;;  %vm112_vm6 = vcmp.lt.f32.partialorder %v865_v22, 0.9230769  ;;  %v443_v16 = vld [vmem:[#allocation6 + $0x450] sm:$0xff]  ;;  %v452_v17 = vld [vmem:[#allocation6 + $0x498] sm:$0xff]  ;;  %v450_v54 = vld [vmem:[#allocation6 + $0x488] sm:$0xff] }
  0x56   :  { %497 = vmatmul.f32.vlgmr.msra.gmra.mxu0 %v65_v38  ;;  %vm113_vm7 = vmand %vm111_vm5, %vm112_vm6  ;;  %vm115_vm8 = vcmp.ge.f32.partialorder %v865_v22, 0.9230769  ;;  %vm116_vm9 = vcmp.lt.f32.partialorder %v865_v22, 1.0  ;;  %v729_v44 = vadd.f32 -10.0, %v876_v26  ;;  %v171_v12 = vsub.f32 12.0, %v876_v26  ;;  %v451_v49 = vld [vmem:[#allocation6 + $0x490] sm:$0xff] }
  0x57   :  { %686 = vmatpush.msra.mxu2 %v475_v62  ;;  %665 = vmatpush.msra.mxu1 %v460_v27  ;;  %v253_v62 = vadd.f32 %v252_v45, %v250_v35  ;;  %v267_v5 = vmul.f32 %v266_v1, %v1042_v56  ;;  %v258_v6 = vadd.f32 %v257_v58, %v255_v52  ;;  %v114_v11 = vsel %vm113_vm7, 1.0, %v842_v28  ;;  %vm117_vm10 = vmand %vm115_vm8, %vm116_vm9 }
  0x58   :  { %641 = vmatpush.msra.mxu0 %v448_v33  ;;  %v168_v29 = vadd.f32 %v167_v2, %v165_v51  ;;  %v220_v0 = vmul.f32 %v738_v3, %v1031_v40  ;;  %v118_v14 = vsel %vm117_vm10, 1.0, %v842_v28  ;;  %v730_v22 = vadd.f32 -11.0, %v876_v26  ;;  %v442_v33 = vld [vmem:[#allocation6 + $0x448] sm:$0xff]  ;;  %v441_v40 = vld [vmem:[#allocation6 + $0x440] sm:$0xff] }
  0x59   :  { %687 = vmatpush.msra.mxu2 %v474_v8  ;;  %666 = vmatpush.msra.mxu1 %v459_v42  ;;  %v221_v8 = vsub.f32 5.5, %v885_v31  ;;  %v268_v59 = vadd.f32 %v267_v5, %v265_v57  ;;  %v176_v15 = vsub.f32 13.0, %v876_v26  ;;  %v170_v19 = vmul.f32 %v729_v44, %v110_v61  ;;  %v453_v26 = vld [vmem:[#allocation6 + $0x4a0] sm:$0xff]  ;;  %v436_v5 = vld [vmem:[#allocation6 + $0x418] sm:$0xff] }
  0x5a   :  { %642 = vmatpush.msra.mxu0 %v447_v39  ;;  %597 = vmatmul.f32.vlgmr.msrb.gmra.mxu1 %v258_v6  ;;  %v739_v21 = vadd.f32 -4.5, %v885_v31  ;;  %v226_v23 = vsub.f32 6.0, %v885_v31  ;;  %v175_v27 = vmul.f32 %v730_v22, %v114_v11  ;;  %v740_v30 = vadd.f32 -5.0, %v885_v31  ;;  %v437_v2 = vld [vmem:[#allocation6 + $0x420] sm:$0xff]  ;;  %v435_v6 = vld [vmem:[#allocation6 + $0x410] sm:$0xff] }
  0x5b   :  { %688 = vmatpush.msra.mxu2 %v473_v20  ;;  %667 = vmatpush.msra.mxu1 %v458_v43  ;;  %v172_v20 = vmul.f32 %v171_v12, %v114_v11  ;;  %v222_v25 = vmul.f32 %v221_v8, %v168_v29  ;;  %v177_v28 = vmul.f32 %v176_v15, %v118_v14  ;;  %v231_v36 = vsub.f32 6.5, %v885_v31  ;;  %v434_v8 = vld [vmem:[#allocation6 + $0x408] sm:$0xff] }
  0x5c   :  { %643 = vmatpush.msra.mxu0 %v446_v55  ;;  %637 = vmatmul.f32.vlgmr.msrb.gmra.mxu3 %v268_v59  ;;  %v225_v35 = vmul.f32 %v739_v21, %v168_v29  ;;  %v748_v39 = vadd.f32 -2.6666667, %v888_v32  ;;  %v749_v43 = vadd.f32 -3.0, %v888_v32  ;;  %v276_v45 = vsub.f32 4.0, %v888_v32  ;;  %v433_v59 = vld [vmem:[#allocation6 + $0x400] sm:$0xff] }
  0x5d   :  { %689 = vmatpush.msra.mxu2 %v472_v37  ;;  %668 = vmatpush.msra.mxu1 %v457_v60  ;;  %v173_v34 = vadd.f32 %v172_v20, %v170_v19  ;;  %v466_v37 = vld [vmem:[#allocation6 + $0x508] sm:$0xff]  ;;  %v178_v38 = vadd.f32 %v177_v28, %v175_v27  ;;  %v223_v1 = vadd.f32 %v222_v25, %v220_v0  ;;  %v281_v47 = vsub.f32 4.3333335, %v888_v32 }
  0x5e   :  { %644 = vmatpush.msra.mxu0 %v445_v4  ;;  %v438_v60 = vld [vmem:[#allocation6 + $0x428] sm:$0xff]  ;;  %v747_v3 = vadd.f32 -2.3333333, %v888_v32  ;;  %v271_v4 = vsub.f32 3.6666667, %v888_v32 }
  0x5f   :  { %690 = vmatpush.msra.mxu2 %v471_v48  ;;  %669 = vmatpush.msra.mxu1 %v456_v7  ;;  %v227_v41 = vmul.f32 %v226_v23, %v173_v34  ;;  %v230_v42 = vmul.f32 %v740_v30, %v173_v34  ;;  %v232_v31 = vmul.f32 %v231_v36, %v178_v38  ;;  %v440_v48 = vld [vmem:[#allocation6 + $0x438] sm:$0xff] }
  0x60   :  { %577 = vmatmul.f32.vlgmr.msrb.gmra.mxu0 %v253_v62  ;;  %v275_v52 = vmul.f32 %v748_v39, %v223_v1  ;;  %v449_v62 = vld [vmem:[#allocation6 + $0x480] sm:$0xff]  ;;  %v270_v7 = vmul.f32 %v747_v3, %v1042_v56  ;;  %v272_v29 = vmul.f32 %v271_v4, %v223_v1 }
  0x61   :  { %691 = vmatpush.msra.mxu2 %v470_v53  ;;  %645 = vmatpush.msra.mxu0 %v444_v9  ;;  %v228_v50 = vadd.f32 %v227_v41, %v225_v35  ;;  %v233_v51 = vadd.f32 %v232_v31, %v230_v42  ;;  %v439_v53 = vld [vmem:[#allocation6 + $0x430] sm:$0xff] }
  0x62   :  { %670 = vmatpush.msra.mxu1 %v455_v10  ;;  %v273_v9 = vadd.f32 %v272_v29, %v270_v7 }
  0x63   :  { %692 = vmatpush.msra.mxu2 %v469_v63  ;;  %646 = vmatpush.msra.mxu0 %v443_v16  ;;  %v280_v55 = vmul.f32 %v749_v43, %v228_v50  ;;  %v277_v57 = vmul.f32 %v276_v45, %v228_v50  ;;  %v282_v58 = vmul.f32 %v281_v47, %v233_v51 }
  0x64   :  { %671 = vmatpush.msra.mxu1 %v454_v18 }
  0x65   :  { %693 = vmatpush.msra.mxu2 %v468_v13  ;;  %647 = vmatpush.msra.mxu0 %v442_v33  ;;  %v283_v61 = vadd.f32 %v282_v58, %v280_v55  ;;  %v278_v63 = vadd.f32 %v277_v57, %v275_v52 }
  0x66   :  { %672 = vmatpush.msra.mxu1 %v453_v26 }
  0x67   :  { %694 = vmatpush.msra.mxu2 %v467_v24  ;;  %648 = vmatpush.msra.mxu0 %v441_v40 }
  0x68   :  { %673 = vmatpush.msra.mxu1 %v452_v17 }
  0x69   :  { %695 = vmatpush.msra.mxu2 %v466_v37  ;;  %649 = vmatpush.msra.mxu0 %v440_v48 }
  0x6a   :  { %674 = vmatpush.msra.mxu1 %v451_v49 }
  0x6b   :  { %696 = vmatpush.msra.mxu2 %v465_v46  ;;  %650 = vmatpush.msra.mxu0 %v439_v53 }
  0x6c   :  { %675 = vmatpush.msra.mxu1 %v450_v54  ;;  %697 = vmatmul.f32.vlgmr.msra.gmra.mxu2 %v283_v61 }
  0x6d   :  { %651 = vmatpush.msra.mxu0 %v438_v60 }
  0x6e   :  { %676 = vmatpush.msra.mxu1 %v449_v62 }
  0x6f   :  { %652 = vmatpush.msra.mxu0 %v437_v2  ;;  %677 = vmatmul.f32.vlgmr.msra.gmra.mxu1 %v278_v63 }
  0x71   :  { %653 = vmatpush.msra.mxu0 %v436_v5 }
  0x73   :  { %654 = vmatpush.msra.mxu0 %v435_v6 }
  0x75   :  { %655 = vmatpush.msra.mxu0 %v434_v8 }
  0x77   :  { %656 = vmatpush.msra.mxu0 %v433_v59 }
  0x78   :  { %657 = vmatmul.f32.vlgmr.msra.gmra.mxu0 %v273_v9 }
  0xc9   :  { %v518_v10 = vpop.f32.mrf.mxu1 }
  0xcd   :  { %v538_v44 = vpop.f32.mrf.mxu2 }
  0xcf   :  { %v558_v13 = vpop.f32.mrf.mxu3 }
  0xd3   :  { %v498_v32 = vpop.f32.mrf.mxu0 }
  0xd4   :  { %v519_v11 = vadd.f32 %v518_v10, %v498_v32 }
  0xd6   :  { %v539_v12 = vadd.f32 %v538_v44, %v519_v11 }
  0xd7   :  { %v598_v15 = vpop.f32.mrf.mxu1  ;;  %v618_v16 = vpop.f32.mrf.mxu2 }
  0xd8   :  { %v559_v0 = vadd.f32 %v558_v13, %v539_v12 }
  0xdd   :  { %v578_v14 = vpop.f32.mrf.mxu0 }
  0xde   :  { %v579_v22 = vadd.f32 %v578_v14, %v559_v0 }
  0xdf   :  { %v638_v19 = vpop.f32.mrf.mxu3 }
  0xe0   :  { %v599_v56 = vadd.f32 %v598_v15, %v579_v22 }
  0xe2   :  { %v619_v18 = vadd.f32 %v618_v16, %v599_v56 }
  0xe4   :  { %v639_v20 = vadd.f32 %v638_v19, %v619_v18 }
  0xec   :  { %v678_v23 = vpop.f32.mrf.mxu1 }
  0xef   :  { %v698_v25 = vpop.f32.mrf.mxu2 }
  0xf5   :  { %v658_v21 = vpop.f32.mrf.mxu0 }
  0xf6   :  { %v659_v24 = vadd.f32 %v658_v21, %v639_v20 }
  0xf8   :  { %v679_v27 = vadd.f32 %v678_v23, %v659_v24 }
  0xfa   :  { %v699_v28 = vadd.f32 %v698_v25, %v679_v27 }
  0xfc   :  { %701 = vst [vmem:[#allocation8] sm:$0xff] %v699_v28 }
  0xfd   :  { %712 = dma.vmem_to_hbm [thread:$0]  %s708_s1, 128, %s710_s23, [#allocation5]  }
  0xfe   :  { %836 = dma.done.wait [#allocation5], 128  }
  0xff   :  { %837 = vsyncadd [#allocation5], 4294967168 }
 0x100   :  { %717 = vsyncpa [#allocation4], 1 }
 0x101   :  { %718 = vsyncpa [#allocation7], 1 }
 0x102   :  { %719 = vsyncpa [#allocation5], 1 }

</bundles_post_ra>
